<compile_context>
chip_gen: v7x
topology: tpu7x:2x2x1
jax: 0.10.0
libtpu: 0.0.40
codegen_flags: <defaults>
</compile_context>

<pallas_src>
import functools
import math

import jax
import jax.numpy as jnp
from jax.experimental import pallas as pl
from jax.experimental.pallas import tpu as pltpu


def _erf(z):
    # Abramowitz & Stegun 7.1.26 rational approximation, |err| <= 1.5e-7.
    # Keeps nn.GELU()'s exact-erf semantics using only VPU/EUP-lowerable ops.
    a1, a2, a3, a4, a5 = (0.254829592, -0.284496736, 1.421413741,
                          -1.453152027, 1.061405429)
    p = 0.3275911
    sign = jnp.where(z < 0.0, -1.0, 1.0)
    az = jnp.abs(z)
    # EUP approx reciprocal: frees VALU slots (separate bundle slot).
    t = pl.reciprocal(1.0 + p * az, approx=True)
    poly = ((((a5 * t + a4) * t + a3) * t + a2) * t + a1) * t
    return sign * (1.0 - poly * jnp.exp(-az * az))


def _gelu_exact(x):
    # nn.GELU() default (approximate='none'): x * 0.5 * (1 + erf(x / sqrt(2)))
    return 0.5 * x * (1.0 + _erf(x * (1.0 / math.sqrt(2.0))))


def _mlp_kernel(x_ref, w1_ref, b1_ref, w2_ref, b2_ref, out_ref, *, eps):
    x = x_ref[...].astype(jnp.float32)                       # (TM, D)

    # ---- LayerNorm stats in one pass (biased variance, like torch.nn.LayerNorm).
    # The affine (gamma/beta) is folded into w1/b1 on the host.
    mean = jnp.mean(x, axis=-1, keepdims=True)
    meansq = jnp.mean(x * x, axis=-1, keepdims=True)
    var = meansq - mean * mean
    xn = (x - mean) * jax.lax.rsqrt(var + eps)

    # ---- Linear(dim -> hidden): bf16 MXU operands, f32 accumulate.
    h = jnp.dot(xn.astype(jnp.bfloat16), w1_ref[...],
                preferred_element_type=jnp.float32) + b1_ref[...]
    h = _gelu_exact(h)

    # ---- Dropout(p=0) is a no-op in eval; Linear(hidden -> dim).
    y = jnp.dot(h.astype(jnp.bfloat16), w2_ref[...],
                preferred_element_type=jnp.float32) + b2_ref[...]
    out_ref[...] = y.astype(out_ref.dtype)


def _pick_block_rows(R, block_rows):
    # Multiple of 8 sublanes, no bigger than the row count.
    tm = min(block_rows, max(R, 8))
    tm = max(8, (tm // 8) * 8)
    # Prefer >= 2 row-blocks so the "parallel" axis can split across both v7x
    # TensorCores (harmless on v5e/v6e which have a single TC).
    if pl.cdiv(R, tm) < 2 and R > 8:
        half = ((pl.cdiv(R, 2) + 7) // 8) * 8
        tm = max(8, min(tm, half))
    return tm


def _vmem_limit_bytes(tm, D, H):
    bf, f32 = 2, 4
    weights = 2 * (D * H * bf + H * D * bf)          # bf16 w1/w2, double-buffered
    biases = 2 * (H * f32 + D * f32)
    acts = 2 * 2 * (tm * D * f32)                    # x in + out, double-buffered
    interm = tm * H * f32 * 3 + tm * D * f32 * 4     # h/gelu/xn + headroom
    total = weights + biases + acts + interm + (2 << 20)
    return int(min(64 << 20, max(32 << 20, total)))  # stay within v7x physical VMEM


def mlp_forward(x, params, *, block_rows=512, eps=1e-5):
    """x: (..., D). params: dict of MLP weights (PyTorch conventions)."""
    orig_shape = x.shape
    D = orig_shape[-1]
    H = params["w1"].shape[0]

    # Flatten all leading dims into a single row axis (the whole MLP is row-wise).
    xf = x.reshape(-1, D)
    R = xf.shape[0]

    tm = _pick_block_rows(R, block_rows)
    n_blocks = pl.cdiv(R, tm)
    Rp = n_blocks * tm
    if Rp != R:
        xf = jnp.pad(xf, ((0, Rp - R), (0, 0)))

    # Host-side (one-time) weight prep:
    #   * transpose PyTorch (out,in) weights to (in,out),
    #   * fold the LayerNorm affine into the first Linear,
    #   * cast matmul operands to bf16 (biases stay f32, added post-accumulate).
    w1_t = params["w1"].T.astype(jnp.float32)                 # (D, H)
    w2_t = params["w2"].T.astype(jnp.float32)                 # (H, D)
    gamma = params["ln_gamma"].astype(jnp.float32)            # (D,)
    beta = params["ln_beta"].astype(jnp.float32)               # (D,)
    w1_eff = (gamma[:, None] * w1_t).astype(jnp.bfloat16)      # (D, H) bf16
    b1_eff = (params["b1"].astype(jnp.float32) + beta @ w1_t).reshape(1, H)
    w2_bf = w2_t.astype(jnp.bfloat16)                          # (H, D) bf16
    b2 = params["b2"].reshape(1, D).astype(jnp.float32)

    const = lambda i: (0, 0)  # same block every step -> DMA'd once, stays in VMEM

    out = pl.pallas_call(
        functools.partial(_mlp_kernel, eps=eps),
        out_shape=jax.ShapeDtypeStruct((Rp, D), x.dtype),
        grid=(n_blocks,),
        in_specs=[
            pl.BlockSpec((tm, D), lambda i: (i, 0)),   # x row-block
            pl.BlockSpec((D, H), const),               # gamma-folded w1^T (bf16)
            pl.BlockSpec((1, H), const),               # folded b1 (f32)
            pl.BlockSpec((H, D), const),               # w2^T (bf16)
            pl.BlockSpec((1, D), const),               # b2 (f32)
        ],
        out_specs=pl.BlockSpec((tm, D), lambda i: (i, 0)),
        compiler_params=pltpu.CompilerParams(
            dimension_semantics=("parallel",),
            vmem_limit_bytes=_vmem_limit_bytes(tm, D, H)),
    )(xf, w1_eff, b1_eff, w2_bf, b2)

    if Rp != R:
        out = out[:R]
    return out.reshape(orig_shape)


def mlp_reference(x, params, eps=1e-5):
    """Pure-JAX f32 reference mirroring the PyTorch forward, for validation."""
    mean = jnp.mean(x, axis=-1, keepdims=True)
    var = jnp.mean((x - mean) ** 2, axis=-1, keepdims=True)
    xn = (x - mean) / jnp.sqrt(var + eps)
    xn = xn * params["ln_gamma"] + params["ln_beta"]
    h = xn @ params["w1"].T + params["b1"]
    h = 0.5 * h * (1.0 + jax.scipy.special.erf(h / jnp.sqrt(2.0)))  # exact GELU
    return h @ params["w2"].T + params["b2"]


if __name__ == "__main__":
    # Small but lane-dense shapes: R = B*S = 256 rows -> two 128-row grid steps.
    B, S, D, H = 2, 128, 128, 256

    key = jax.random.PRNGKey(0)
    ks = jax.random.split(key, 8)
    params = {
        "ln_gamma": 1.0 + 0.1 * jax.random.normal(ks[0], (D,), jnp.float32),
        "ln_beta": 0.02 * jax.random.normal(ks[1], (D,), jnp.float32),
        "w1": jax.random.normal(ks[2], (H, D), jnp.float32) * 0.05,
        "b1": jax.random.normal(ks[3], (H,), jnp.float32) * 0.01,
        "w2": jax.random.normal(ks[4], (D, H), jnp.float32) * 0.05,
        "b2": jax.random.normal(ks[5], (D,), jnp.float32) * 0.01,
    }
    x = jax.random.normal(ks[6], (B, S, D), jnp.float32)

    out = jax.block_until_ready(mlp_forward(x, params))
    ref = mlp_reference(x, params)

    assert out.shape == x.shape
    max_err = float(jnp.max(jnp.abs(out - ref)))
    # bf16 MXU operands (f32 accumulate) -> expected max deviation of a few e-3.
    assert jnp.allclose(out, ref, atol=2e-2, rtol=2e-2), f"mismatch, max_err={max_err}"

    print("KERNEL_OK")
</pallas_src>

<mosaic_0001>
module attributes {stable_mosaic.version = 11 : i64} {
  func.func @_mlp_kernel(%arg0: i32, %arg1: memref<128x128xf32, #tpu.memory_space<vmem>>, %arg2: memref<128x256xbf16, #tpu.memory_space<vmem>>, %arg3: memref<1x256xf32, #tpu.memory_space<vmem>>, %arg4: memref<256x128xbf16, #tpu.memory_space<vmem>>, %arg5: memref<1x128xf32, #tpu.memory_space<vmem>>, %arg6: memref<128x128xf32, #tpu.memory_space<vmem>>) attributes {dimension_semantics = [#tpu.dimension_semantics<parallel>], iteration_bounds = array<i64: 2>, scalar_prefetch = 0 : i64, scratch_operands = 0 : i64, tpu.core_type = #tpu.core_type<tc>, window_params = [{transform_indices = @transform_0, window_bounds = array<i64: 128, 128>}, {pipeline_mode = #tpu.pipeline_mode<synchronous>, transform_indices = @transform_1, window_bounds = array<i64: 128, 256>}, {pipeline_mode = #tpu.pipeline_mode<synchronous>, transform_indices = @transform_2, window_bounds = array<i64: 1, 256>}, {pipeline_mode = #tpu.pipeline_mode<synchronous>, transform_indices = @transform_3, window_bounds = array<i64: 256, 128>}, {pipeline_mode = #tpu.pipeline_mode<synchronous>, transform_indices = @transform_4, window_bounds = array<i64: 1, 128>}, {transform_indices = @transform_5, window_bounds = array<i64: 128, 128>}]} {
    %c0 = arith.constant 0 : index
    %c0_0 = arith.constant 0 : index
    %0 = vector.load %arg1[%c0, %c0_0] : memref<128x128xf32, #tpu.memory_space<vmem>>, vector<128x128xf32>
    %cst = arith.constant dense<0.000000e+00> : vector<128xf32>
    %1 = vector.multi_reduction <add>, %0, %cst [1] : vector<128x128xf32> to vector<128xf32>
    %2 = vector.shape_cast %1 : vector<128xf32> to vector<128x1xf32>
    %cst_1 = arith.constant 1.280000e+02 : f32
    %3 = vector.broadcast %cst_1 : f32 to vector<128x1xf32>
    %4 = arith.divf %2, %3 : vector<128x1xf32>
    %5 = arith.mulf %0, %0 : vector<128x128xf32>
    %cst_2 = arith.constant dense<0.000000e+00> : vector<128xf32>
    %6 = vector.multi_reduction <add>, %5, %cst_2 [1] : vector<128x128xf32> to vector<128xf32>
    %7 = vector.shape_cast %6 : vector<128xf32> to vector<128x1xf32>
    %cst_3 = arith.constant 1.280000e+02 : f32
    %8 = vector.broadcast %cst_3 : f32 to vector<128x1xf32>
    %9 = arith.divf %7, %8 : vector<128x1xf32>
    %10 = arith.mulf %4, %4 : vector<128x1xf32>
    %11 = arith.subf %9, %10 : vector<128x1xf32>
    %12 = vector.broadcast %4 : vector<128x1xf32> to vector<128x128xf32>
    %13 = arith.subf %0, %12 : vector<128x128xf32>
    %cst_4 = arith.constant 9.99999974E-6 : f32
    %14 = vector.broadcast %cst_4 : f32 to vector<128x1xf32>
    %15 = arith.addf %11, %14 : vector<128x1xf32>
    %16 = math.rsqrt %15 : vector<128x1xf32>
    %17 = vector.broadcast %16 : vector<128x1xf32> to vector<128x128xf32>
    %18 = arith.mulf %13, %17 : vector<128x128xf32>
    %19 = arith.truncf %18 : vector<128x128xf32> to vector<128x128xbf16>
    %c0_5 = arith.constant 0 : index
    %c0_6 = arith.constant 0 : index
    %20 = vector.load %arg2[%c0_5, %c0_6] : memref<128x256xbf16, #tpu.memory_space<vmem>>, vector<128x256xbf16>
    %cst_7 = arith.constant dense<0.000000e+00> : vector<128x256xf32>
    %21 = tpu.matmul %19, %20, %cst_7 {dimension_numbers = #tpu.dot_dimension_numbers<[1], [0], [0], [1], [0, 0, 1, 1], [], []>} : vector<128x128xbf16>, vector<128x256xbf16>, vector<128x256xf32> -> vector<128x256xf32>
    %c0_8 = arith.constant 0 : index
    %c0_9 = arith.constant 0 : index
    %22 = vector.load %arg3[%c0_8, %c0_9] : memref<1x256xf32, #tpu.memory_space<vmem>>, vector<1x256xf32>
    %23 = vector.broadcast %22 : vector<1x256xf32> to vector<128x256xf32>
    %24 = arith.addf %21, %23 : vector<128x256xf32>
    %cst_10 = arith.constant 5.000000e-01 : f32
    %25 = vector.broadcast %cst_10 : f32 to vector<128x256xf32>
    %26 = arith.mulf %25, %24 : vector<128x256xf32>
    %cst_11 = arith.constant 0.707106769 : f32
    %27 = vector.broadcast %cst_11 : f32 to vector<128x256xf32>
    %28 = arith.mulf %24, %27 : vector<128x256xf32>
    %cst_12 = arith.constant 0.000000e+00 : f32
    %29 = vector.broadcast %cst_12 : f32 to vector<128x256xf32>
    %30 = arith.cmpf olt, %28, %29 : vector<128x256xf32>
    %cst_13 = arith.constant -1.000000e+00 : f32
    %cst_14 = arith.constant 1.000000e+00 : f32
    %31 = vector.broadcast %cst_13 : f32 to vector<128x256xf32>
    %32 = vector.broadcast %cst_14 : f32 to vector<128x256xf32>
    %33 = arith.select %30, %31, %32 : vector<128x256xi1>, vector<128x256xf32>
    %34 = math.absf %28 : vector<128x256xf32>
    %cst_15 = arith.constant 0.327591091 : f32
    %35 = vector.broadcast %cst_15 : f32 to vector<128x256xf32>
    %36 = arith.mulf %35, %34 : vector<128x256xf32>
    %cst_16 = arith.constant 1.000000e+00 : f32
    %37 = vector.broadcast %cst_16 : f32 to vector<128x256xf32>
    %38 = arith.addf %37, %36 : vector<128x256xf32>
    %39 = tpu.reciprocal %38 {approx = true} : vector<128x256xf32> -> vector<128x256xf32>
    %cst_17 = arith.constant 1.06140542 : f32
    %40 = vector.broadcast %cst_17 : f32 to vector<128x256xf32>
    %41 = arith.mulf %40, %39 : vector<128x256xf32>
    %cst_18 = arith.constant -1.45315206 : f32
    %42 = vector.broadcast %cst_18 : f32 to vector<128x256xf32>
    %43 = arith.addf %41, %42 : vector<128x256xf32>
    %44 = arith.mulf %43, %39 : vector<128x256xf32>
    %cst_19 = arith.constant 1.42141378 : f32
    %45 = vector.broadcast %cst_19 : f32 to vector<128x256xf32>
    %46 = arith.addf %44, %45 : vector<128x256xf32>
    %47 = arith.mulf %46, %39 : vector<128x256xf32>
    %cst_20 = arith.constant -0.284496725 : f32
    %48 = vector.broadcast %cst_20 : f32 to vector<128x256xf32>
    %49 = arith.addf %47, %48 : vector<128x256xf32>
    %50 = arith.mulf %49, %39 : vector<128x256xf32>
    %cst_21 = arith.constant 0.254829586 : f32
    %51 = vector.broadcast %cst_21 : f32 to vector<128x256xf32>
    %52 = arith.addf %50, %51 : vector<128x256xf32>
    %53 = arith.mulf %52, %39 : vector<128x256xf32>
    %cst_22 = arith.constant 0.000000e+00 : f32
    %54 = vector.broadcast %cst_22 : f32 to vector<128x256xf32>
    %55 = arith.subf %54, %34 : vector<128x256xf32>
    %56 = arith.mulf %55, %34 : vector<128x256xf32>
    %57 = math.exp %56 : vector<128x256xf32>
    %58 = arith.mulf %53, %57 : vector<128x256xf32>
    %cst_23 = arith.constant 1.000000e+00 : f32
    %59 = vector.broadcast %cst_23 : f32 to vector<128x256xf32>
    %60 = arith.subf %59, %58 : vector<128x256xf32>
    %61 = arith.mulf %33, %60 : vector<128x256xf32>
    %cst_24 = arith.constant 1.000000e+00 : f32
    %62 = vector.broadcast %cst_24 : f32 to vector<128x256xf32>
    %63 = arith.addf %62, %61 : vector<128x256xf32>
    %64 = arith.mulf %26, %63 : vector<128x256xf32>
    %65 = arith.truncf %64 : vector<128x256xf32> to vector<128x256xbf16>
    %c0_25 = arith.constant 0 : index
    %c0_26 = arith.constant 0 : index
    %66 = vector.load %arg4[%c0_25, %c0_26] : memref<256x128xbf16, #tpu.memory_space<vmem>>, vector<256x128xbf16>
    %cst_27 = arith.constant dense<0.000000e+00> : vector<128x128xf32>
    %67 = tpu.matmul %65, %66, %cst_27 {dimension_numbers = #tpu.dot_dimension_numbers<[1], [0], [0], [1], [0, 0, 1, 1], [], []>} : vector<128x256xbf16>, vector<256x128xbf16>, vector<128x128xf32> -> vector<128x128xf32>
    %c0_28 = arith.constant 0 : index
    %c0_29 = arith.constant 0 : index
    %68 = vector.load %arg5[%c0_28, %c0_29] : memref<1x128xf32, #tpu.memory_space<vmem>>, vector<1x128xf32>
    %69 = vector.broadcast %68 : vector<1x128xf32> to vector<128x128xf32>
    %70 = arith.addf %67, %69 : vector<128x128xf32>
    %c0_30 = arith.constant 0 : index
    %c0_31 = arith.constant 0 : index
    %71 = vector.load %arg6[%c0_30, %c0_31] : memref<128x128xf32, #tpu.memory_space<vmem>>, vector<128x128xf32>
    tpu.vector_store %arg6[%c0_30, %c0_31], %70 {strides = array<i32>} : memref<128x128xf32, #tpu.memory_space<vmem>>, vector<128x128xf32>,
    return
  }
  func.func @transform_0(%arg0: i32) -> (i32, i32) {
    %c0_i32 = arith.constant 0 : i32
    %c0_i32_0 = arith.constant 0 : i32
    return %arg0, %c0_i32 : i32, i32
  }
  func.func @transform_1(%arg0: i32) -> (i32, i32) {
    %c0_i32 = arith.constant 0 : i32
    %c0_i32_0 = arith.constant 0 : i32
    %c0_i32_1 = arith.constant 0 : i32
    return %c0_i32, %c0_i32_0 : i32, i32
  }
  func.func @transform_2(%arg0: i32) -> (i32, i32) {
    %c0_i32 = arith.constant 0 : i32
    %c0_i32_0 = arith.constant 0 : i32
    %c0_i32_1 = arith.constant 0 : i32
    return %c0_i32, %c0_i32_0 : i32, i32
  }
  func.func @transform_3(%arg0: i32) -> (i32, i32) {
    %c0_i32 = arith.constant 0 : i32
    %c0_i32_0 = arith.constant 0 : i32
    %c0_i32_1 = arith.constant 0 : i32
    return %c0_i32, %c0_i32_0 : i32, i32
  }
  func.func @transform_4(%arg0: i32) -> (i32, i32) {
    %c0_i32 = arith.constant 0 : i32
    %c0_i32_0 = arith.constant 0 : i32
    %c0_i32_1 = arith.constant 0 : i32
    return %c0_i32, %c0_i32_0 : i32, i32
  }
  func.func @transform_5(%arg0: i32) -> (i32, i32) {
    %c0_i32 = arith.constant 0 : i32
    %c0_i32_0 = arith.constant 0 : i32
    return %arg0, %c0_i32 : i32, i32
  }
}

</mosaic_0001>

<bundles_post_ra>
// kernel: tpu_custom_call.1
= control target key start
LH: loop header
LB: loop body
LE: loop exit
PB: predicated region body
PF: predicated region fallthrough
CT: control target
= control target key end

     0   :  { %10 = vsyncpa [#allocation3], 0  ;;  %s3915_s0 = inlined_call_operand.hbm [shape: f32[256,128], index: 0, kind: input, shape index: {}]   ;;  %s3916_s1 = inlined_call_operand.hbm [shape: bf16[128,256], index: 1, kind: input, shape index: {}]   ;;  %s3917_s2 = inlined_call_operand.vmem [shape: f32[1,256], index: 2, kind: input, shape index: {}]   ;;  %s3918_s3 = inlined_call_operand.hbm [shape: bf16[256,128], index: 3, kind: input, shape index: {}]   ;;  %s3919_s4 = inlined_call_operand.vmem [shape: f32[1,128], index: 4, kind: input, shape index: {}]   ;;  %s3920_s5 = inlined_call_operand.hbm [shape: f32[256,128], index: 5, kind: output, shape index: {}]  }
   0x1   :  { %12 = vsyncpa [#allocation3 + $0x1], 0 }
   0x2   :  { %13 = vsyncpa [#allocation6], 0 }
   0x3   :  { %14 = vsyncpa [#allocation4], 0 }
   0x4   :  { %16 = vsyncpa [#allocation4 + $0x1], 0  ;;  %s2523_s18 = smov 0   ;;  %s2525_s19 = smov 0  }
   0x5   :  { %s2527_s20 = smov 0   ;;  %s2529_s21 = smov 0  }
   0x6 LB: > { %s2544_s22 = sadd.s32 4294967295, %s2479_s21   ;;  %s1931_s23 = sadd.s32 4294967294, %s2479_s21   ;;  %s2479_s21 = sphi %s2529_s21, %s4007_s21   ;;  %s2475_s20 = sphi %s2527_s20, %s4006_s20   ;;  %s2471_s19 = sphi %s2525_s19, %s4005_s19   ;;  %s2467_s18 = sphi %s2523_s18, %s4004_s18  }
   0x7   : > { %p42_p0 = scmp.ne.s32.totalorder %s2471_s19, %s2467_s18  ;;  %p3921_p1 = scmp.eq.s32.totalorder %s2544_s22, 0 }
   0x8   : > { %p156_p3 = scmp.eq.s32.totalorder %s1931_s23, 1  ;;  %p1932_p5 = scmp.ge.s32.totalorder %s2479_s21, 1 }
   0x9   : > { %p2553_p4 = por %p3921_p1, %p42_p0  ;;  %p163_p7 = scmp.lt.s32.totalorder %s2479_s21, 3 }
   0xa   : > { %p2558_p6 = por %p156_p3, %p42_p0  ;;  %s2481_s27 = smov [#allocation5]  }
   0xb   : > { %s3937_s24 = scalar_select %p2553_p4, 1, 0 }
   0xc   : > { %s3938_s25 = scalar_select %p2558_p6, 1, 0 }
   0xd   : > { %p2563_p8 = pnand %p1932_p5, %p163_p7  ;;  %s175_s28 = sshll.u32 %s2481_s27, 4  ;;  %s2567_s28 = int_to_ptr.vmem [resolvable:$true] %s175_s28 }
   0xe   : > { %s2482_s30 = smov [#allocation7]   ;;  %s2323_s9 = scalar_lea.hbm %s3916_s1, 2048 }
   0xf   : > { %p2060_p9 = pneg %p2563_p8  ;;  %s191_s6 = sshll.u32 %s2482_s30, 4  ;;  %s2578_s6 = int_to_ptr.vmem [resolvable:$true] %s191_s6 }
  0x10   : > { %p2324_p12 = scmp.ne.s32.totalorder %s3916_s1, %s2323_s9  ;;  %p2330_p5 = scmp.lt.u32.totalorder %s2323_s9, %s3916_s1 }
  0x11   : > { %p2574_p11 = pnand %p2060_p9, %p3921_p1 }
  0x13   : > { %p2325_p13 = pneg %p2574_p11 }
  0x15   : > { %p2326_p0 = pnand %p2325_p13, %p2324_p12 }
  0x17   : > { %p2327_p3 = pneg %p2326_p0 }
  0x19   : > { %p2332_p7 = pnand %p2330_p5, %p2327_p3 }
  0x1b   : > { %2335 = shalt.err (!%p2332_p7)
}
  0x1c   : > { %s2336_s14 = scalar_lea.vmem %s2567_s28, 2048  ;;  %p2344_p2 = scmp.lt.s32.totalorder %s2567_s28, %s2567_s28 }
  0x1d   : > { %p2337_p9 = scmp.ne.s32.totalorder %s2567_s28, %s2336_s14  ;;  %p2345_p12 = scmp.lt.s32.totalorder %s2336_s14, %s2336_s14 }
  0x1f   : > { %p2339_p10 = pnand %p2337_p9, %p2325_p13  ;;  %p2346_p0 = por %p2345_p12, %p2344_p2 }
  0x21   : > { %p2340_p1 = pneg %p2339_p10 }
  0x23   : > { %p2347_p6 = pnand %p2346_p0, %p2340_p1 }
  0x25   : > { %2350 = shalt.err (!%p2347_p6)
}
  0x26   : > { %s2483_s15 = smov 128   ;;  %s2484_s16 = smov 8  }
  0x27   : > { %2063 = dma.hbm_to_vmem [thread:$0]  (!%p2574_p11), %s3916_s1, 2048, %s2567_s28, [#allocation6], %s2483_s15, %s2483_s15, %s2484_s16  }
  0x28   : > { %s2351_s7 = scalar_lea.hbm %s3918_s3, 2048 }
  0x29   : > { %p2352_p1 = scmp.ne.s32.totalorder %s3918_s3, %s2351_s7  ;;  %p2358_p10 = scmp.lt.u32.totalorder %s2351_s7, %s3918_s3 }
  0x2b   : > { %p2354_p2 = pnand %p2352_p1, %p2325_p13 }
  0x2d   : > { %p2355_p6 = pneg %p2354_p2 }
  0x2f   : > { %p2360_p3 = pnand %p2358_p10, %p2355_p6 }
  0x31   : > { %2363 = shalt.err (!%p2360_p3)
}
  0x32   : > { %s2364_s28 = scalar_lea.vmem %s2578_s6, 2048  ;;  %p2372_p12 = scmp.lt.s32.totalorder %s2578_s6, %s2578_s6 }
  0x33   : > { %p2365_p5 = scmp.ne.s32.totalorder %s2578_s6, %s2364_s28  ;;  %p2373_p0 = scmp.lt.s32.totalorder %s2364_s28, %s2364_s28 }
  0x35   : > { %p2367_p7 = pnand %p2365_p5, %p2325_p13  ;;  %p2374_p1 = por %p2373_p0, %p2372_p12 }
  0x37   : > { %p2368_p9 = pneg %p2367_p7 }
  0x39   : > { %p2375_p2 = pnand %p2374_p1, %p2368_p9 }
  0x3b   : > { %2378 = shalt.err (!%p2375_p2)
}
  0x3c   : > { %s2485_s12 = smov 64   ;;  %s2486_s13 = smov 4  }
  0x3d   : > { %2066 = dma.hbm_to_vmem [thread:$0]  (!%p2574_p11), %s3918_s3, 2048, %s2578_s6, [#allocation6], %s2485_s12, %s2485_s12, %s2486_s13  }
  0x3e   : > { %s2636_s23 = sadd.s32 1, %s2479_s21   ;;  %s29_s30 = sadd.s32 1, %s2475_s20 }
  0x3f   : > { %s26_s27 = ssub.s32 %s2479_s21, %s2636_s23  ;;  %p36_p6 = scmp.ne.s32.totalorder %s2475_s20, %s2471_s19 }
  0x40   : > { %p27_p13 = scmp.eq.s32.totalorder %s26_s27, 0  ;;  %p37_p10 = scmp.eq.s32.totalorder %s2479_s21, 0 }
  0x41   : > { %p3941_p5 = scmp.eq.s32.totalorder %s2544_s22, 1  ;;  %p2077_p9 = scmp.lt.s32.totalorder %s2479_s21, 2 }
  0x42   : > { %s2645_s7 = scalar_select %p27_p13, %s2475_s20, %s29_s30  }
  0x43   : > { %p38_p3 = por %p37_p10, %p36_p6  ;;  %p2649_p7 = por %p3941_p5, %p36_p6 }
  0x44   : > { %s208_s29 = sand.u32 1, %s2475_s20   ;;  %s1982_s6 = sshll.u32 %s2479_s21, 11 }
  0x45   : > { %s3942_s8 = scalar_select %p2649_p7, 1, 0 }
  0x46   : > { %s1936_s9 = sshll.u32 %s208_s29, 7  ;;  %s2659_s28 = scalar_lea.hbm %s3915_s0, %s1982_s6 }
  0x47   : > { %s212_s12 = scalar_lea.vmem [#allocation2], %s1936_s9  ;;  %p2663_p11 = pnand %p2077_p9, %p38_p3 }
  0x48   : > { %s219_s13 = sshll.u32 %s212_s12, 4  ;;  %s2667_s17 = scalar_lea.sflag [#allocation3], %s208_s29  ;;  %s2661_s13 = int_to_ptr.vmem [resolvable:$true] %s219_s13 }
  0x49   : > { %s2379_s27 = scalar_lea.hbm %s2659_s28, 2048  ;;  %p2381_p0 = pneg %p2663_p11 }
  0x4a   : > { %p2380_p12 = scmp.ne.s32.totalorder %s2659_s28, %s2379_s27  ;;  %s2384_s6 = scalar_lea.hbm %s3915_s0, 4096 }
  0x4b   : > { %p2385_p13 = scmp.lt.u32.totalorder %s2659_s28, %s3915_s0  ;;  %p2386_p6 = scmp.lt.u32.totalorder %s2384_s6, %s2379_s27 }
  0x4c   : > { %p2382_p1 = pnand %p2381_p0, %p2380_p12  ;;  %p2388_p3 = scmp.lt.u32.totalorder %s2379_s27, %s2659_s28 }
  0x4d   : > { %p2387_p10 = por %p2386_p6, %p2385_p13 }
  0x4e   : > { %p2383_p2 = pneg %p2382_p1 }
  0x4f   : > { %p2389_p5 = por %p2388_p3, %p2387_p10 }
  0x51   : > { %p2390_p9 = pnand %p2389_p5, %p2383_p2 }
  0x53   : > { %2393 = shalt.err (!%p2390_p9)
}
  0x54   : > { %s2394_s29 = scalar_lea.vmem %s2661_s13, 2048  ;;  %s2487_s12 = smov [#allocation2]  }
  0x55   : > { %p2395_p12 = scmp.ne.s32.totalorder %s2661_s13, %s2394_s29  ;;  %s2399_s30 = sshll.u32 %s2487_s12, 4  ;;  %s2400_s30 = int_to_ptr.vmem [resolvable:$false] %s2399_s30 }
  0x56   : > { %s2401_s9 = scalar_lea.vmem %s2400_s30, 4096  ;;  %p2402_p4 = scmp.lt.s32.totalorder %s2661_s13, %s2400_s30 }
  0x57   : > { %p2397_p1 = pnand %p2395_p12, %p2381_p0  ;;  %p2403_p13 = scmp.lt.s32.totalorder %s2401_s9, %s2394_s29 }
  0x59   : > { %p2398_p7 = pneg %p2397_p1  ;;  %p2404_p6 = por %p2403_p13, %p2402_p4 }
  0x5b   : > { %p2405_p10 = pnand %p2404_p6, %p2398_p7 }
  0x5d   : > { %2408 = shalt.err (!%p2405_p10)
}
  0x5e   : > { %2070 = dma.hbm_to_vmem [thread:$0]  (!%p2663_p11), %s2659_s28, 2048, %s2661_s13, %s2667_s17, %s2483_s15, %s2483_s15, %s2484_s16  }
  0x5f   : > { %231 = sbr.rel (%p2563_p8) target bundleno = 980 (0x3d4), region = 40 }
  0x66   : > { %s2701_s27 = sand.u32 1, %s2471_s19   ;;  %p3944_p4 = scmp.ne.s32.totalorder %s3937_s24, 0 }
  0x67   : > { %s1940_s6 = sshll.u32 %s2701_s27, 7  ;;  %s234_s10 = scalar_lea.sflag [#allocation3], %s2701_s27 }
  0x68   : > { %s2707_s14 = scalar_lea.vmem [#allocation2], %s1940_s6 }
  0x69   : > { %2454 = dma.done.wait (%p3944_p4), %s234_s10, 2048  }
  0x6a   : > { %2456 = vsyncadd (%p3944_p4), %s234_s10, 4294965248  ;;  %p3945_p7 = scmp.eq.s32.totalorder %s2544_s22, 0 }
  0x6c   : > { %2458 = dma.done.wait (%p3945_p7), [#allocation6], 4096   ;;  %p3946_p8 = pmov %p3945_p7 }
  0x6d   : > { %v2718_v0 = vld [vmem:[%s2707_s14] sm:$0xff]  ;;  %v2721_v1 = vld [vmem:[%s2707_s14 + $0x8] sm:$0xff]  ;;  %v2730_v4 = vld [vmem:[%s2707_s14 + $0x10] sm:$0xff]  ;;  %v2488_v39 = vmov 0   ;;  %s3831_s28 = scalar_lea.vmem [#allocation8], %s1940_s6  ;;  %s1983_s13 = sshll.u32 %s2544_s22, 11 }
  0x6e   : > { %2460 = vsyncadd (%p3946_p8), [#allocation6], 4294963200  ;;  %291 = vadd.xlane.f32.xlu0 %v2718_v0  ;;  %v340_v2 = vmul.f32 %v2718_v0, %v2718_v0  ;;  %v341_v3 = vmul.f32 %v2721_v1, %v2721_v1  ;;  %v2733_v5 = vld [vmem:[%s2707_s14 + $0x18] sm:$0xff]  ;;  %v2123_v6 = vld [vmem:[#allocation5 + $0x4] ss:$8 sps:$4 sm:$0xff]   ;;  %v342_v9 = vmul.f32 %v2730_v4, %v2730_v4  ;;  %648 = vmatprep.mubr.bf16.mxu0 %v2488_v39  ;;  %s1839_s17 = sshll.u32 %s3831_s28, 4  ;;  %s3866_s12 = scalar_lea.hbm %s3920_s5, %s1983_s13  ;;  %s3868_s17 = int_to_ptr.vmem [resolvable:$true] %s1839_s17 }
  0x6f   : > { %v2125_v7 = vld [vmem:[#allocation5] ss:$8 sps:$4 sm:$0xff]   ;;  %v2126_v8 = vld [vmem:[#allocation5 + $0x14] ss:$8 sps:$4 sm:$0xff]   ;;  %616 = vmatprep.subr.bf16.mxu0 %v2123_v6  ;;  %v343_v10 = vmul.f32 %v2733_v5, %v2733_v5  ;;  %v2128_v12 = vld [vmem:[#allocation5 + $0x10] ss:$8 sps:$4 sm:$0xff]  }
  0x70   : > { %356 = vadd.xlane.f32.xlu1 %v340_v2  ;;  %617 = vmatpush1.bf16.msra.mxu0 %v2125_v7  ;;  %v2742_v11 = vld [vmem:[%s2707_s14 + $0x20] sm:$0xff]  ;;  %v2745_v13 = vld [vmem:[%s2707_s14 + $0x28] sm:$0xff]  ;;  %v2754_v18 = vld [vmem:[%s2707_s14 + $0x30] sm:$0xff]  ;;  %s1826_s22 = scalar_lea.sflag [#allocation4], %s2701_s27  ;;  %s2409_s30 = scalar_lea.vmem %s3868_s17, 2048 }
  0x71   : > { %618 = vmatprep.subr.bf16.mxu0 %v2126_v8  ;;  %v2129_v14 = vld [vmem:[#allocation5 + $0x24] ss:$8 sps:$4 sm:$0xff]   ;;  %v344_v15 = vmul.f32 %v2742_v11, %v2742_v11  ;;  %v2131_v16 = vld [vmem:[#allocation5 + $0x20] ss:$8 sps:$4 sm:$0xff]   ;;  %v345_v17 = vmul.f32 %v2745_v13, %v2745_v13  ;;  %v2132_v19 = vld [vmem:[#allocation5 + $0x34] ss:$8 sps:$4 sm:$0xff]   ;;  %v346_v23 = vmul.f32 %v2754_v18, %v2754_v18  ;;  %p2410_p11 = scmp.ne.s32.totalorder %s3868_s17, %s2409_s30 }
  0x72   : > { %293 = vadd.xlane.f32.xlu0 %v2721_v1  ;;  %v2134_v20 = vld [vmem:[#allocation5 + $0x30] ss:$8 sps:$4 sm:$0xff]   ;;  %v2135_v22 = vld [vmem:[#allocation5 + $0x44] ss:$8 sps:$4 sm:$0xff]   ;;  %v2137_v24 = vld [vmem:[#allocation5 + $0x40] ss:$8 sps:$4 sm:$0xff]  }
  0x73   : > { %v2757_v21 = vld [vmem:[%s2707_s14 + $0x38] sm:$0xff]  ;;  %v2766_v28 = vld [vmem:[%s2707_s14 + $0x40] sm:$0xff]  ;;  %v2769_v29 = vld [vmem:[%s2707_s14 + $0x48] sm:$0xff]  ;;  %p4001_p0 = scmp.ne.s32.totalorder %s3942_s8, 0  ;;  %s2490_s9 = smov [#allocation8]  }
  0x74   : > { %358 = vadd.xlane.f32.xlu1 %v341_v3  ;;  %619 = vmatpush1.bf16.msra.mxu0 %v2128_v12  ;;  %v347_v25 = vmul.f32 %v2757_v21, %v2757_v21  ;;  %v2138_v26 = vld [vmem:[#allocation5 + $0x54] ss:$8 sps:$4 sm:$0xff]   ;;  %v2140_v27 = vld [vmem:[#allocation5 + $0x50] ss:$8 sps:$4 sm:$0xff]   ;;  %v348_v30 = vmul.f32 %v2766_v28, %v2766_v28  ;;  %v2141_v31 = vld [vmem:[#allocation5 + $0x64] ss:$8 sps:$4 sm:$0xff]   ;;  %v349_v33 = vmul.f32 %v2769_v29, %v2769_v29 }
  0x75   : > { %620 = vmatprep.subr.bf16.mxu0 %v2129_v14  ;;  %v2143_v32 = vld [vmem:[#allocation5 + $0x60] ss:$8 sps:$4 sm:$0xff]   ;;  %v2144_v34 = vld [vmem:[#allocation5 + $0x74] ss:$8 sps:$4 sm:$0xff]   ;;  %v2146_v36 = vld [vmem:[#allocation5 + $0x70] ss:$8 sps:$4 sm:$0xff]   ;;  %p2411_p2 = pnand %p2410_p11, %p4001_p0 }
  0x76   : > { %295 = vadd.xlane.f32.xlu0 %v2730_v4  ;;  %v2778_v35 = vld [vmem:[%s2707_s14 + $0x50] sm:$0xff]  ;;  %v2781_v37 = vld [vmem:[%s2707_s14 + $0x58] sm:$0xff]  ;;  %v2791_v41 = vld [vmem:[%s2707_s14 + $0x60] sm:$0xff]  ;;  %s2413_s6 = sshll.u32 %s2490_s9, 4  ;;  %s2414_s6 = int_to_ptr.vmem [resolvable:$false] %s2413_s6 }
  0x77   : > { %v350_v38 = vmul.f32 %v2778_v35, %v2778_v35  ;;  %v351_v40 = vmul.f32 %v2781_v37, %v2781_v37  ;;  %v2794_v42 = vld [vmem:[%s2707_s14 + $0x68] sm:$0xff]  ;;  %v352_v43 = vmul.f32 %v2791_v41, %v2791_v41  ;;  %v2803_v45 = vld [vmem:[%s2707_s14 + $0x70] sm:$0xff]  ;;  %v2806_v46 = vld [vmem:[%s2707_s14 + $0x78] sm:$0xff]  ;;  %p2412_p3 = pneg %p2411_p2  ;;  %s2415_s10 = scalar_lea.vmem %s2414_s6, 4096 }
  0x78   : > { %297 = vadd.xlane.f32.xlu1 %v2733_v5  ;;  %621 = vmatpush1.bf16.msra.mxu0 %v2131_v16  ;;  %v353_v44 = vmul.f32 %v2794_v42, %v2794_v42  ;;  %v354_v47 = vmul.f32 %v2803_v45, %v2803_v45  ;;  %v355_v48 = vmul.f32 %v2806_v46, %v2806_v46  ;;  %p2416_p5 = scmp.lt.s32.totalorder %s3868_s17, %s2414_s6  ;;  %p2417_p9 = scmp.lt.s32.totalorder %s2415_s10, %s2409_s30 }
  0x79   : > { %622 = vmatprep.subr.bf16.mxu0 %v2132_v19 }
  0x7a   : > { %360 = vadd.xlane.f32.xlu0 %v342_v9  ;;  %p2418_p12 = por %p2417_p9, %p2416_p5 }
  0x7c   : > { %362 = vadd.xlane.f32.xlu1 %v343_v10  ;;  %623 = vmatpush1.bf16.msra.mxu0 %v2134_v20  ;;  %p2419_p1 = pnand %p2418_p12, %p2412_p3 }
  0x7d   : > { %624 = vmatprep.subr.bf16.mxu0 %v2135_v22 }
  0x7e   : > { %299 = vadd.xlane.f32.xlu0 %v2742_v11 }
  0x80   : > { %301 = vadd.xlane.f32.xlu1 %v2745_v13  ;;  %625 = vmatpush1.bf16.msra.mxu0 %v2137_v24 }
  0x81   : > { %626 = vmatprep.subr.bf16.mxu0 %v2138_v26 }
  0x82   : > { %364 = vadd.xlane.f32.xlu0 %v344_v15 }
  0x84   : > { %366 = vadd.xlane.f32.xlu1 %v345_v17  ;;  %627 = vmatpush1.bf16.msra.mxu0 %v2140_v27 }
  0x85   : > { %628 = vmatprep.subr.bf16.mxu0 %v2141_v31 }
  0x86   : > { %303 = vadd.xlane.f32.xlu0 %v2754_v18 }
  0x88   : > { %305 = vadd.xlane.f32.xlu1 %v2757_v21  ;;  %629 = vmatpush1.bf16.msra.mxu0 %v2143_v32 }
  0x89   : > { %630 = vmatprep.subr.bf16.mxu0 %v2144_v34 }
  0x8a   : > { %368 = vadd.xlane.f32.xlu0 %v346_v23 }
  0x8c   : > { %370 = vadd.xlane.f32.xlu1 %v347_v25  ;;  %631 = vmatpush1.bf16.msra.mxu0 %v2146_v36 }
  0x8e   : > { %307 = vadd.xlane.f32.xlu0 %v2766_v28 }
  0x90   : > { %309 = vadd.xlane.f32.xlu1 %v2769_v29 }
  0x92   : > { %372 = vadd.xlane.f32.xlu0 %v348_v30 }
  0x94   : > { %374 = vadd.xlane.f32.xlu1 %v349_v33 }
  0x96   : > { %311 = vadd.xlane.f32.xlu0 %v2778_v35 }
  0x98   : > { %313 = vadd.xlane.f32.xlu1 %v2781_v37 }
  0x9a   : > { %376 = vadd.xlane.f32.xlu0 %v350_v38 }
  0x9c   : > { %378 = vadd.xlane.f32.xlu1 %v351_v40 }
  0x9e   : > { %315 = vadd.xlane.f32.xlu0 %v2791_v41 }
  0xa0   : > { %317 = vadd.xlane.f32.xlu1 %v2794_v42 }
  0xa2   : > { %380 = vadd.xlane.f32.xlu0 %v352_v43 }
  0xa4   : > { %382 = vadd.xlane.f32.xlu1 %v353_v44 }
  0xa6   : > { %319 = vadd.xlane.f32.xlu0 %v2803_v45 }
  0xa8   : > { %321 = vadd.xlane.f32.xlu1 %v2806_v46 }
  0xaa   : > { %384 = vadd.xlane.f32.xlu0 %v354_v47 }
  0xac   : > { %386 = vadd.xlane.f32.xlu1 %v355_v48 }
  0xfb   : > { %v292_v49 = vpop.xlane.xlu0 %291 }
  0xfc   : > { %v324_v50 = vmul.f32 0.0078125, %v292_v49 }
  0xfd   : > { %v357_v51 = vpop.xlane.xlu1 %356 }
  0xfe   : > { %v404_v52 = vmul.f32 %v324_v50, %v324_v50  ;;  %v388_v53 = vmul.f32 0.0078125, %v357_v51  ;;  %v436_v31 = vsub.f32 %v2718_v0, %v324_v50 }
  0xff   : > { %v294_v54 = vpop.xlane.xlu0 %293 }
 0x100   : > { %v420_v55 = vsub.f32 %v388_v53, %v404_v52  ;;  %v325_v56 = vmul.f32 0.0078125, %v294_v54 }
 0x101   : > { %v359_v57 = vpop.xlane.xlu1 %358 }
 0x102   : > { %v452_v58 = vadd.f32 1e-05, %v420_v55  ;;  %v405_v59 = vmul.f32 %v325_v56, %v325_v56  ;;  %v389_v60 = vmul.f32 0.0078125, %v359_v57  ;;  %v437_v32 = vsub.f32 %v2721_v1, %v325_v56 }
 0x103   : > { %v296_v61 = vpop.xlane.xlu0 %295 }
 0x104   : > { %v421_v62 = vsub.f32 %v389_v60, %v405_v59  ;;  %v326_v63 = vmul.f32 0.0078125, %v296_v61  ;;  %2163 = vrsqrt.f32 %v452_v58 }
 0x105   : > { %v298_v2 = vpop.xlane.xlu1 %297 }
 0x106   : > { %v453_v3 = vadd.f32 1e-05, %v421_v62  ;;  %v406_v6 = vmul.f32 %v326_v63, %v326_v63  ;;  %v327_v7 = vmul.f32 0.0078125, %v298_v2  ;;  %v438_v57 = vsub.f32 %v2730_v4, %v326_v63 }
 0x107   : > { %v361_v8 = vpop.xlane.xlu0 %360 }
 0x108   : > { %2165 = vrsqrt.f32 %v453_v3  ;;  %v390_v9 = vmul.f32 0.0078125, %v361_v8  ;;  %v407_v12 = vmul.f32 %v327_v7, %v327_v7  ;;  %v439_v58 = vsub.f32 %v2733_v5, %v327_v7 }
 0x109   : > { %v363_v10 = vpop.xlane.xlu1 %362 }
 0x10a   : > { %v422_v14 = vsub.f32 %v390_v9, %v406_v6  ;;  %v391_v15 = vmul.f32 0.0078125, %v363_v10 }
 0x10b   : > { %v300_v16 = vpop.xlane.xlu0 %299 }
 0x10c   : > { %v454_v17 = vadd.f32 1e-05, %v422_v14  ;;  %v423_v19 = vsub.f32 %v391_v15, %v407_v12  ;;  %v2814_v20 = vmul.f32 0.0078125, %v300_v16 }
 0x10d   : > { %v302_v22 = vpop.xlane.xlu1 %301 }
 0x10e   : > { %2167 = vrsqrt.f32 %v454_v17  ;;  %v455_v23 = vadd.f32 1e-05, %v423_v19  ;;  %v408_v24 = vmul.f32 %v2814_v20, %v2814_v20  ;;  %v2818_v25 = vmul.f32 0.0078125, %v302_v22  ;;  %v2164_v27 = vpop.eup %2163 }
 0x10f   : > { %v365_v26 = vpop.xlane.xlu0 %364  ;;  %v484_v44 = vmul.f32 %v2164_v27, %v436_v31  ;;  %v440_v19 = vsub.f32 %v2742_v11, %v2814_v20 }
 0x110   : > { %2169 = vrsqrt.f32 %v455_v23  ;;  %v392_v30 = vmul.f32 0.0078125, %v365_v26  ;;  %v409_v36 = vmul.f32 %v2818_v25, %v2818_v25  ;;  %v441_v22 = vsub.f32 %v2745_v13, %v2818_v25 }
 0x111   : > { %v367_v33 = vpop.xlane.xlu1 %366 }
 0x112   : > { %v2166_v34 = vpop.eup %2165  ;;  %v424_v38 = vsub.f32 %v392_v30, %v408_v24  ;;  %v393_v40 = vmul.f32 0.0078125, %v367_v33 }
 0x113   : > { %v304_v43 = vpop.xlane.xlu0 %303  ;;  %v485_v47 = vmul.f32 %v2166_v34, %v437_v32 }
 0x114   : > { %v456_v48 = vadd.f32 1e-05, %v424_v38  ;;  %v425_v49 = vsub.f32 %v393_v40, %v409_v36  ;;  %v2824_v51 = vmul.f32 0.0078125, %v304_v43 }
 0x115   : > { %v306_v52 = vpop.xlane.xlu1 %305  ;;  %v500_v53 = vpack.c.bf16 %v485_v47, %v484_v44 }
 0x116   : > { %2171 = vrsqrt.f32 %v456_v48  ;;  %v457_v0 = vadd.f32 1e-05, %v425_v49  ;;  %v410_v1 = vmul.f32 %v2824_v51, %v2824_v51  ;;  %v2828_v50 = vmul.f32 0.0078125, %v306_v52 }
 0x117   : > { %v369_v54 = vpop.xlane.xlu0 %368  ;;  %649 = vmatmul.mubr.bf16.vlgmr.msra.gmra.mrb[0].mxu0 %v500_v53  ;;  %v442_v48 = vsub.f32 %v2754_v18, %v2824_v51 }
 0x118   : > { %v2168_v55 = vpop.eup %2167  ;;  %2173 = vrsqrt.f32 %v457_v0  ;;  %v394_v56 = vmul.f32 0.0078125, %v369_v54  ;;  %658 = vmatprep.mubr.bf16.mxu0 %v2488_v39  ;;  %v411_v61 = vmul.f32 %v2828_v50, %v2828_v50  ;;  %v443_v49 = vsub.f32 %v2757_v21, %v2828_v50 }
 0x119   : > { %v371_v59 = vpop.xlane.xlu1 %370  ;;  %v486_v6 = vmul.f32 %v2168_v55, %v438_v57 }
 0x11a   : > { %v2170_v60 = vpop.eup %2169  ;;  %v426_v62 = vsub.f32 %v394_v56, %v410_v1  ;;  %v395_v2 = vmul.f32 0.0078125, %v371_v59 }
 0x11b   : > { %v308_v3 = vpop.xlane.xlu0 %307  ;;  %v487_v8 = vmul.f32 %v2170_v60, %v439_v58 }
 0x11c   : > { %v458_v9 = vadd.f32 1e-05, %v426_v62  ;;  %v427_v10 = vsub.f32 %v395_v2, %v411_v61  ;;  %v2835_v12 = vmul.f32 0.0078125, %v308_v3 }
 0x11d   : > { %v310_v14 = vpop.xlane.xlu1 %309  ;;  %v501_v15 = vpack.c.bf16 %v487_v8, %v486_v6 }
 0x11e   : > { %2175 = vrsqrt.f32 %v458_v9  ;;  %v459_v4 = vadd.f32 1e-05, %v427_v10  ;;  %v412_v5 = vmul.f32 %v2835_v12, %v2835_v12  ;;  %v2839_v63 = vmul.f32 0.0078125, %v310_v14 }
 0x11f   : > { %v373_v7 = vpop.xlane.xlu0 %372  ;;  %659 = vmatmul.mubr.bf16.gmra.mrb[4].mxu0 %v501_v15  ;;  %v444_v6 = vsub.f32 %v2766_v28, %v2835_v12 }
 0x120   : > { %v2172_v16 = vpop.eup %2171  ;;  %2177 = vrsqrt.f32 %v459_v4  ;;  %v396_v17 = vmul.f32 0.0078125, %v373_v7  ;;  %668 = vmatprep.mubr.bf16.mxu0 %v2488_v39  ;;  %v413_v26 = vmul.f32 %v2839_v63, %v2839_v63  ;;  %v445_v8 = vsub.f32 %v2769_v29, %v2839_v63 }
 0x121   : > { %v375_v23 = vpop.xlane.xlu1 %374  ;;  %v488_v32 = vmul.f32 %v2172_v16, %v440_v19 }
 0x122   : > { %v2174_v24 = vpop.eup %2173  ;;  %v428_v27 = vsub.f32 %v396_v17, %v412_v5  ;;  %v397_v30 = vmul.f32 0.0078125, %v375_v23 }
 0x123   : > { %v312_v31 = vpop.xlane.xlu0 %311  ;;  %v489_v33 = vmul.f32 %v2174_v24, %v441_v22 }
 0x124   : > { %v460_v34 = vadd.f32 1e-05, %v428_v27  ;;  %v429_v36 = vsub.f32 %v397_v30, %v413_v26  ;;  %v2848_v38 = vmul.f32 0.0078125, %v312_v31 }
 0x125   : > { %v314_v40 = vpop.xlane.xlu1 %313  ;;  %v502_v43 = vpack.c.bf16 %v489_v33, %v488_v32 }
 0x126   : > { %2179 = vrsqrt.f32 %v460_v34  ;;  %v461_v11 = vadd.f32 1e-05, %v429_v36  ;;  %v414_v13 = vmul.f32 %v2848_v38, %v2848_v38  ;;  %v2852_v20 = vmul.f32 0.0078125, %v314_v40 }
 0x127   : > { %v377_v25 = vpop.xlane.xlu0 %376  ;;  %669 = vmatmul.mubr.bf16.gmra.mrb[8].mxu0 %v502_v43  ;;  %v446_v30 = vsub.f32 %v2778_v35, %v2848_v38 }
 0x128   : > { %v2176_v44 = vpop.eup %2175  ;;  %2181 = vrsqrt.f32 %v461_v11  ;;  %v398_v47 = vmul.f32 0.0078125, %v377_v25  ;;  %678 = vmatprep.mubr.bf16.mxu0 %v2488_v39  ;;  %v415_v0 = vmul.f32 %v2852_v20, %v2852_v20  ;;  %v447_v31 = vsub.f32 %v2781_v37, %v2852_v20 }
 0x129   : > { %v379_v52 = vpop.xlane.xlu1 %378  ;;  %v490_v56 = vmul.f32 %v2176_v44, %v442_v48 }
 0x12a   : > { %v2178_v53 = vpop.eup %2177  ;;  %v430_v1 = vsub.f32 %v398_v47, %v414_v13  ;;  %v399_v54 = vmul.f32 0.0078125, %v379_v52 }
 0x12b   : > { %v316_v55 = vpop.xlane.xlu0 %315  ;;  %v491_v57 = vmul.f32 %v2178_v53, %v443_v49 }
 0x12c   : > { %v462_v58 = vadd.f32 1e-05, %v430_v1  ;;  %v431_v59 = vsub.f32 %v399_v54, %v415_v0  ;;  %v336_v60 = vmul.f32 0.0078125, %v316_v55 }
 0x12d   : > { %v318_v61 = vpop.xlane.xlu1 %317  ;;  %v503_v62 = vpack.c.bf16 %v491_v57, %v490_v56 }
 0x12e   : > { %2183 = vrsqrt.f32 %v462_v58  ;;  %v463_v18 = vadd.f32 1e-05, %v431_v59  ;;  %v416_v51 = vmul.f32 %v336_v60, %v336_v60  ;;  %v337_v2 = vmul.f32 0.0078125, %v318_v61  ;;  %v2149_v58 = vld [vmem:[#allocation7 + $0x48] sm:$0xff]   ;;  %v2154_v61 = vld [vmem:[#allocation7 + $0x18] sm:$0xff]  }
 0x12f   : > { %v381_v21 = vpop.xlane.xlu0 %380  ;;  %679 = vmatmul.mubr.bf16.gmra.mrb[12].mxu0 %v503_v62  ;;  %v448_v35 = vsub.f32 %v2791_v41, %v336_v60  ;;  %v2147_v41 = vld [vmem:[#allocation7 + $0x40] sm:$0xff]   ;;  %v2150_v59 = vld [vmem:[#allocation7 + $0x8] sm:$0xff]   ;;  %v2151_v60 = vld [vmem:[#allocation7 + $0x50] sm:$0xff]   ;;  %v526_v62 = vlaneseq }
 0x130   : > { %v2180_v50 = vpop.eup %2179  ;;  %2185 = vrsqrt.f32 %v463_v18  ;;  %v400_v3 = vmul.f32 0.0078125, %v381_v21  ;;  %688 = vmatprep.mubr.bf16.mxu0 %v2488_v39  ;;  %v417_v14 = vmul.f32 %v337_v2, %v337_v2  ;;  %v449_v37 = vsub.f32 %v2794_v42, %v337_v2  ;;  %1984 = vmatprep.subr.bf16.mxu1 %v2147_v41  ;;  %v2148_v42 = vld [vmem:[#allocation7] sm:$0xff]  }
 0x131   : > { %v383_v9 = vpop.xlane.xlu1 %382  ;;  %v492_v7 = vmul.f32 %v2180_v50, %v444_v6  ;;  %1985 = vmatpush3.bf16.msra.mxu1 %v2148_v42  ;;  %v527_v18 = vshrl.u32 %v526_v62, 7  ;;  %v524_v21 = vld [vmem:[%s3917_s2] sm:$0x3] }
 0x132   : > { %v2182_v10 = vpop.eup %2181  ;;  %v432_v15 = vsub.f32 %v400_v3, %v416_v51  ;;  %v401_v4 = vmul.f32 0.0078125, %v383_v9  ;;  %1986 = vmatprep.subr.bf16.mxu1 %v2149_v58  ;;  %v2156_v51 = vld [vmem:[#allocation7 + $0x20] sm:$0xff]  }
 0x133   : > { %v320_v5 = vpop.xlane.xlu0 %319  ;;  %v493_v16 = vmul.f32 %v2182_v10, %v445_v8  ;;  %v528_v2 = vsub.s32 0, %v527_v18  ;;  %v532_v50 = vsub.s32 1, %v527_v18 }
 0x134   : > { %v464_v17 = vadd.f32 1e-05, %v432_v15  ;;  %v433_v19 = vsub.f32 %v401_v4, %v417_v14  ;;  %v338_v22 = vmul.f32 0.0078125, %v320_v5 }
 0x135   : > { %v322_v23 = vpop.xlane.xlu1 %321  ;;  %v504_v24 = vpack.c.bf16 %v493_v16, %v492_v7  ;;  %1987 = vmatpush3.bf16.msra.mxu1 %v2150_v59  ;;  %v2880_v3 = vrot.slane %v524_v21, %v528_v2  ;;  %v2882_v6 = vrot.slane %v524_v21, %v532_v50 }
 0x136   : > { %2187 = vrsqrt.f32 %v464_v17  ;;  %v465_v26 = vadd.f32 1e-05, %v433_v19  ;;  %v418_v27 = vmul.f32 %v338_v22, %v338_v22  ;;  %v339_v28 = vmul.f32 0.0078125, %v322_v23  ;;  %1988 = vmatprep.subr.bf16.mxu1 %v2151_v60  ;;  %v2157_v17 = vld [vmem:[#allocation7 + $0x68] sm:$0xff]  }
 0x137   : > { %v385_v12 = vpop.xlane.xlu0 %384  ;;  %689 = vmatmul.mubr.bf16.gmra.mrb[16].mxu0 %v504_v24  ;;  %v450_v0 = vsub.f32 %v2803_v45, %v338_v22  ;;  %v2153_v45 = vld [vmem:[#allocation7 + $0x58] sm:$0xff]   ;;  %v2158_v23 = vld [vmem:[#allocation7 + $0x28] sm:$0xff]  }
 0x138   : > { %v2184_v29 = vpop.eup %2183  ;;  %2189 = vrsqrt.f32 %v465_v26  ;;  %v402_v63 = vmul.f32 0.0078125, %v385_v12  ;;  %698 = vmatprep.mubr.bf16.mxu0 %v2488_v39  ;;  %v419_v34 = vmul.f32 %v339_v28, %v339_v28  ;;  %v451_v1 = vsub.f32 %v2806_v46, %v339_v28  ;;  %v2155_v46 = vld [vmem:[#allocation7 + $0x60] sm:$0xff]  }
 0x139   : > { %v387_v32 = vpop.xlane.xlu1 %386  ;;  %v494_v43 = vmul.f32 %v2184_v29, %v446_v30 }
 0x13a   : > { %v2186_v33 = vpop.eup %2185  ;;  %v434_v36 = vsub.f32 %v402_v63, %v418_v27  ;;  %v403_v40 = vmul.f32 0.0078125, %v387_v32  ;;  %v2159_v32 = vld [vmem:[#allocation7 + $0x70] sm:$0xff]  }
 0x13b   : > { %v495_v11 = vmul.f32 %v2186_v33, %v447_v31 }
 0x13c   : > { %v466_v13 = vadd.f32 1e-05, %v434_v36  ;;  %v435_v25 = vsub.f32 %v403_v40, %v419_v34 }
 0x13d   : > { %v505_v44 = vpack.c.bf16 %v495_v11, %v494_v43 }
 0x13e   : > { %2191 = vrsqrt.f32 %v466_v13  ;;  %v467_v47 = vadd.f32 1e-05, %v435_v25 }
 0x13f   : > { %699 = vmatmul.mubr.bf16.gmra.mrb[20].mxu0 %v505_v44 }
 0x140   : > { %v2188_v48 = vpop.eup %2187  ;;  %2193 = vrsqrt.f32 %v467_v47  ;;  %708 = vmatprep.mubr.bf16.mxu0 %v2488_v39 }
 0x141   : > { %v496_v20 = vmul.f32 %v2188_v48, %v448_v35 }
 0x142   : > { %v2190_v38 = vpop.eup %2189 }
 0x143   : > { %v497_v49 = vmul.f32 %v2190_v38, %v449_v37 }
 0x145   : > { %v506_v52 = vpack.c.bf16 %v497_v49, %v496_v20  ;;  %v2160_v20 = vld [vmem:[#allocation7 + $0x30] sm:$0xff]  }
 0x147   : > { %709 = vmatmul.mubr.bf16.gmra.mrb[24].mxu0 %v506_v52 }
 0x148   : > { %v2192_v53 = vpop.eup %2191  ;;  %718 = vmatprep.mubr.bf16.mxu0 %v2488_v39  ;;  %v2152_v39 = vld [vmem:[#allocation7 + $0x10] sm:$0xff]  }
 0x149   : > { %v498_v55 = vmul.f32 %v2192_v53, %v450_v0  ;;  %1989 = vmatpush3.bf16.msra.mxu1 %v2152_v39 }
 0x14a   : > { %v2194_v54 = vpop.eup %2193  ;;  %1990 = vmatprep.subr.bf16.mxu1 %v2153_v45 }
 0x14b   : > { %v499_v56 = vmul.f32 %v2194_v54, %v451_v1 }
 0x14d   : > { %v507_v57 = vpack.c.bf16 %v499_v56, %v498_v55  ;;  %1991 = vmatpush3.bf16.msra.mxu1 %v2154_v61 }
 0x14e   : > { %1992 = vmatprep.subr.bf16.mxu1 %v2155_v46 }
 0x14f   : > { %719 = vmatmul.mubr.bf16.gmra.mrb[28].mxu0 %v507_v57  ;;  %v3924_v57 = vmov 1.0  }
 0x151   : > { %1993 = vmatpush3.bf16.msra.mxu1 %v2156_v51 }
 0x152   : > { %1994 = vmatprep.subr.bf16.mxu1 %v2157_v17 }
 0x155   : > { %1995 = vmatpush3.bf16.msra.mxu1 %v2158_v23 }
 0x156   : > { %1996 = vmatprep.subr.bf16.mxu1 %v2159_v32 }
 0x159   : > { %1997 = vmatpush3.bf16.msra.mxu1 %v2160_v20 }
 0x1ea   : > { %v650_v8 = vpop.f32.mrb[0].mxu0 }
 0x1eb   : > { %v651_v9 = vadd.f32 %v650_v8, %v2880_v3  ;;  %v652_v10 = vpop.f32.mrb[1].mxu0 }
 0x1ec   : > { %v653_v14 = vadd.f32 %v652_v10, %v2882_v6  ;;  %v654_v15 = vpop.f32.mrb[2].mxu0 }
 0x1ed   : > { %v761_v4 = vmul.f32 0.70710677, %v651_v9  ;;  %v655_v5 = vadd.f32 %v654_v15, %v2880_v3  ;;  %v656_v7 = vpop.f32.mrb[3].mxu0  ;;  %v2906_v1 = vmul.f32 0.5, %v651_v9 }
 0x1ee   : > { %v2887_v16 = vmul.f32 0.70710677, %v653_v14  ;;  %v657_v28 = vadd.f32 %v656_v7, %v2882_v6  ;;  %v2918_v42 = vmul.f32 0.5, %v653_v14 }
 0x1ef   : > { %v857_v19 = vand.u32 2147483647, %v761_v4  ;;  %v2889_v22 = vmul.f32 0.70710677, %v655_v5  ;;  %vm793_vm0 = vcmp.lt.f32.partialorder %v761_v4, 0.0  ;;  %v2920_v58 = vmul.f32 0.5, %v655_v5 }
 0x1f0   : > { %3947 = vst [vmem:[#allocation12_spill] sm:$0xff] %v2887_v16  ;;  %v858_v26 = vand.u32 2147483647, %v2887_v16  ;;  %v2894_v36 = vmul.f32 0.70710677, %v657_v28  ;;  %v2916_v41 = vsel %vm793_vm0, -1.0, %v3924_v57 }
 0x1f1   : > { %v889_v24 = vmul.f32 0.3275911, %v857_v19  ;;  %v859_v27 = vand.u32 2147483647, %v2889_v22  ;;  %v1273_v12 = vsub.f32 0.0, %v857_v19  ;;  %3949 = vst [vmem:[#allocation14_spill] sm:$0xff] %v2918_v42 }
 0x1f2   : > { %v660_v30 = vpop.f32.mrb[4].mxu0  ;;  %v1274_v33 = vsub.f32 0.0, %v858_v26  ;;  %3948 = vst [vmem:[#allocation13_spill] sm:$0xff] %v2894_v36  ;;  %v890_v11 = vmul.f32 0.3275911, %v858_v26  ;;  %vm795_vm1 = vcmp.lt.f32.partialorder %v2889_v22, 0.0 }
 0x1f3   : > { %v921_v29 = vadd.f32 1.0, %v889_v24  ;;  %v891_v63 = vmul.f32 0.3275911, %v859_v27  ;;  %v662_v31 = vpop.f32.mrb[5].mxu0  ;;  %v1305_v43 = vmul.f32 %v1273_v12, %v857_v19  ;;  %v661_v25 = vadd.f32 %v660_v30, %v2880_v3 }
 0x1f4   : > { %v664_v40 = vpop.f32.mrb[6].mxu0  ;;  %v663_v44 = vadd.f32 %v662_v31, %v2882_v6  ;;  %v1275_v47 = vsub.f32 0.0, %v859_v27  ;;  %v1306_v35 = vmul.f32 %v1274_v33, %v858_v26  ;;  %v860_v37 = vand.u32 2147483647, %v2894_v36 }
 0x1f5   : > { %2195 = vrcp.f32 %v921_v29  ;;  %v923_v34 = vadd.f32 1.0, %v891_v63  ;;  %v666_v13 = vpop.f32.mrb[7].mxu0  ;;  %v2899_v48 = vadd.f32 %v664_v40, %v2880_v3  ;;  %v2902_v38 = vmul.f32 0.70710677, %v661_v25 }
 0x1f6   : > { %v1337_v49 = vmul.f32 1.442695, %v1305_v43  ;;  %v922_v52 = vadd.f32 1.0, %v890_v11  ;;  %v2904_v53 = vmul.f32 0.70710677, %v663_v44  ;;  %v1307_v45 = vmul.f32 %v1275_v47, %v859_v27 }
 0x1f7   : > { %2197 = vrcp.f32 %v923_v34  ;;  %v861_v54 = vand.u32 2147483647, %v2902_v38  ;;  %v2910_v55 = vmul.f32 0.70710677, %v2899_v48  ;;  %v1339_v39 = vmul.f32 1.442695, %v1306_v35 }
 0x1f8   : > { %v2923_v59 = vand.u32 2147483647, %v2904_v53  ;;  %2199 = vrcp.f32 %v922_v52  ;;  %v1276_v62 = vsub.f32 0.0, %v860_v37  ;;  %v892_v21 = vmul.f32 0.3275911, %v860_v37 }
 0x1f9   : > { %v893_v61 = vmul.f32 0.3275911, %v861_v54  ;;  %v2932_v51 = vand.u32 2147483647, %v2910_v55  ;;  %2201 = vpow2.f32 %v1337_v49  ;;  %v2937_v8 = vadd.f32 %v666_v13, %v2882_v6 }
 0x1fa   : > { %v670_v0 = vpop.f32.mrb[8].mxu0  ;;  %v894_v18 = vmul.f32 0.3275911, %v2923_v59  ;;  %v2947_v4 = vsel %vm795_vm1, -1.0, %v3924_v57  ;;  %v1341_v5 = vmul.f32 1.442695, %v1307_v45  ;;  %v1308_v19 = vmul.f32 %v1276_v62, %v860_v37 }
 0x1fb   : > { %v2912_v56 = vpop.f32.mrb[9].mxu0  ;;  %v925_v50 = vadd.f32 1.0, %v893_v61  ;;  %v895_v14 = vmul.f32 0.3275911, %v2932_v51  ;;  %v2942_v15 = vadd.f32 %v670_v0, %v2880_v3  ;;  %v2949_v7 = vmul.f32 0.5, %v657_v28  ;;  %v2161_v61 = vld [vmem:[#allocation7 + $0x78] sm:$0xff]  }
 0x1fc   : > { %v2925_v60 = vpop.f32.mrb[10].mxu0  ;;  %v926_v10 = vadd.f32 1.0, %v894_v18  ;;  %v924_v27 = vadd.f32 1.0, %v892_v21  ;;  %v1277_v12 = vsub.f32 0.0, %v861_v54  ;;  %v2956_v29 = vmul.f32 0.70710677, %v2937_v8  ;;  %1998 = vmatprep.subr.bf16.mxu1 %v2161_v61 }
 0x1fd   : > { %v2928_v46 = vpop.f32.mrb[11].mxu0  ;;  %3950 = vst [vmem:[#allocation15_spill] sm:$0xff] %v2949_v7  ;;  %2203 = vrcp.f32 %v925_v50  ;;  %v927_v23 = vadd.f32 1.0, %v895_v14  ;;  %v2962_v30 = vmul.f32 0.5, %v661_v25  ;;  %v2965_v31 = vmul.f32 0.70710677, %v2942_v15 }
 0x1fe   : > { %2205 = vrcp.f32 %v926_v10  ;;  %vm797_vm2 = vcmp.lt.f32.partialorder %v2902_v38, 0.0  ;;  %v2970_v33 = vmul.f32 0.5, %v663_v44  ;;  %v2973_v34 = vand.u32 2147483647, %v2956_v29  ;;  %v2162_v14 = vld [vmem:[#allocation7 + $0x38] sm:$0xff]  }
 0x1ff   : > { %v2934_v2 = vpop.eup %2195  ;;  %2207 = vpow2.f32 %v1339_v39  ;;  %v1343_v13 = vmul.f32 1.442695, %v1308_v19  ;;  %v1309_v25 = vmul.f32 %v1277_v12, %v861_v54  ;;  %v1278_v47 = vsub.f32 0.0, %v2923_v59  ;;  %1999 = vmatpush3.bf16.msra.mxu1 %v2162_v14 }
 0x200   : > { %v985_v9 = vmul.f32 1.0614054, %v2934_v2  ;;  %2209 = vrcp.f32 %v927_v23  ;;  %v2979_v35 = vmul.f32 0.5, %v2899_v48  ;;  %v896_v37 = vmul.f32 0.3275911, %v2973_v34 }
 0x201   : > { %v2953_v26 = vpop.eup %2197  ;;  %2211 = vpow2.f32 %v1341_v5  ;;  %v2989_v52 = vsel %vm797_vm2, -1.0, %v3924_v57  ;;  %v2992_v0 = vand.u32 2147483647, %v2965_v31  ;;  %vm798_vm3 = vcmp.lt.f32.partialorder %v2904_v53, 0.0 }
 0x202   : > { %v1017_v17 = vadd.f32 -1.4531521, %v985_v9  ;;  %v2951_v24 = vpop.f32.mrb[12].mxu0  ;;  %v987_v63 = vmul.f32 1.0614054, %v2953_v26  ;;  %v2982_v44 = vpop.eup %2199  ;;  %v1279_v48 = vsub.f32 0.0, %v2932_v51  ;;  %v3000_v45 = vadd.f32 %v2912_v56, %v2882_v6 }
 0x203   : > { %v2958_v22 = vpop.f32.mrb[13].mxu0  ;;  %3951 = vst [vmem:[#allocation16_spill] sm:$0xff] %v2982_v44  ;;  %v2994_v54 = vpop.eup %2201  ;;  %v928_v39 = vadd.f32 1.0, %v896_v37  ;;  %2213 = vrcp.f32 %v924_v27  ;;  %v897_v38 = vmul.f32 0.3275911, %v2992_v0  ;;  %v1310_v9 = vmul.f32 %v1278_v47, %v2923_v59 }
 0x204   : > { %v1049_v28 = vmul.f32 %v2934_v2, %v1017_v17  ;;  %v2967_v32 = vpop.f32.mrb[14].mxu0  ;;  %v1019_v11 = vadd.f32 -1.4531521, %v987_v63  ;;  %v1345_v50 = vmul.f32 1.442695, %v1309_v25  ;;  %vm799_vm4 = vcmp.lt.f32.partialorder %v2910_v55, 0.0 }
 0x205   : > { %v2975_v40 = vpop.f32.mrb[15].mxu0  ;;  %2215 = vrcp.f32 %v928_v39  ;;  %v929_v23 = vadd.f32 1.0, %v897_v38  ;;  %v3021_v59 = vsel %vm798_vm3, -1.0, %v3924_v57  ;;  %v3025_v63 = vmul.f32 0.70710677, %v3000_v45 }
 0x206   : > { %v1081_v43 = vadd.f32 1.4214138, %v1049_v28  ;;  %v1051_v49 = vmul.f32 %v2953_v26, %v1019_v11  ;;  %2217 = vpow2.f32 %v1343_v13  ;;  %v1311_v47 = vmul.f32 %v1279_v48, %v2932_v51 }
 0x207   : > { %v3003_v21 = vpop.eup %2203  ;;  %2219 = vrcp.f32 %v929_v23  ;;  %v3035_v53 = vsel %vm799_vm4, -1.0, %v3924_v57  ;;  %v3045_v48 = vmul.f32 0.5, %v2942_v15  ;;  %vm800_vm5 = vcmp.lt.f32.partialorder %v2956_v29, 0.0 }
 0x208   : > { %v1113_v20 = vmul.f32 %v2934_v2, %v1081_v43  ;;  %v1083_v18 = vadd.f32 1.4214138, %v1051_v49  ;;  %v3009_v56 = vpop.eup %2205  ;;  %v989_v19 = vmul.f32 1.0614054, %v3003_v21  ;;  %v3038_v49 = vmul.f32 0.5, %v2937_v8 }
 0x209   : > { %v3016_v12 = vpop.eup %2207  ;;  %v990_v28 = vmul.f32 1.0614054, %v3009_v56  ;;  %v3053_v8 = vand.u32 2147483647, %v3025_v63  ;;  %2221 = vpow2.f32 %v1345_v50  ;;  %v1280_v15 = vsub.f32 0.0, %v2973_v34 }
 0x20a   : > { %v1145_v62 = vadd.f32 -0.28449672, %v1113_v20  ;;  %v3007_v10 = vpop.f32.mrb[16].mxu0  ;;  %v1115_v17 = vmul.f32 %v2953_v26, %v1083_v18  ;;  %3952 = vst [vmem:[#allocation17_spill] sm:$0xff] %v3016_v12  ;;  %v1021_v25 = vadd.f32 -1.4531521, %v989_v19  ;;  %v3030_v37 = vpop.eup %2209  ;;  %v677_v36 = vadd.f32 %v2928_v46, %v2882_v6 }
 0x20b   : > { %v3014_v27 = vpop.f32.mrb[17].mxu0  ;;  %v1022_v13 = vadd.f32 -1.4531521, %v990_v28  ;;  %v1347_v20 = vmul.f32 1.442695, %v1310_v9  ;;  %v3040_v39 = vpop.eup %2211  ;;  %vm801_vm6 = vcmp.lt.f32.partialorder %v2965_v31, 0.0  ;;  %v3117_v46 = vadd.f32 %v2951_v24, %v2880_v3 }
 0x20c   : > { %v1177_v5 = vmul.f32 %v2934_v2, %v1145_v62  ;;  %v3027_v43 = vpop.f32.mrb[18].mxu0  ;;  %v1147_v11 = vadd.f32 -0.28449672, %v1115_v17  ;;  %v1053_v62 = vmul.f32 %v3003_v21, %v1021_v25  ;;  %v991_v51 = vmul.f32 1.0614054, %v3030_v37 }
 0x20d   : > { %v3047_v18 = vpop.f32.mrb[19].mxu0  ;;  %v1054_v55 = vmul.f32 %v3009_v56, %v1022_v13  ;;  %2223 = vpow2.f32 %v1347_v20  ;;  %v898_v19 = vmul.f32 0.3275911, %v3053_v8  ;;  %v3057_v23 = vpop.eup %2213  ;;  %v3063_v25 = vsel %vm800_vm5, -1.0, %v3924_v57 }
 0x20e   : > { %v1209_v61 = vadd.f32 0.2548296, %v1177_v5  ;;  %v1179_v38 = vmul.f32 %v2953_v26, %v1147_v11  ;;  %v1085_v9 = vadd.f32 1.4214138, %v1053_v62  ;;  %v1023_v14 = vadd.f32 -1.4531521, %v991_v51 }
 0x20f   : > { %v1349_v5 = vmul.f32 1.442695, %v1311_v47  ;;  %v1086_v17 = vadd.f32 1.4214138, %v1054_v55  ;;  %3953 = vst [vmem:[#allocation18_spill] sm:$0xff] %v3057_v23  ;;  %v3067_v47 = vpop.eup %2215  ;;  %v930_v62 = vadd.f32 1.0, %v898_v19  ;;  %v3072_v51 = vadd.f32 %v2925_v60, %v2880_v3 }
 0x210   : > { %v1241_v28 = vmul.f32 %v2934_v2, %v1209_v61  ;;  %v1117_v11 = vmul.f32 %v3003_v21, %v1085_v9  ;;  %v1055_v29 = vmul.f32 %v3030_v37, %v1023_v14  ;;  %v1211_v13 = vadd.f32 0.2548296, %v1179_v38  ;;  %v3079_v14 = vpop.eup %2217 }
 0x211   : > { %v1118_v20 = vmul.f32 %v3009_v56, %v1086_v17  ;;  %2225 = vpow2.f32 %v1349_v5  ;;  %3954 = vst [vmem:[#allocation19_spill] sm:$0xff] %v3079_v14  ;;  %v992_v38 = vmul.f32 1.0614054, %v3067_v47  ;;  %v1312_v17 = vmul.f32 %v1280_v15, %v2973_v34  ;;  %v3083_v19 = vpop.eup %2219 }
 0x212   : > { %v3065_v50 = vpop.f32.mrb[20].mxu0  ;;  %v1149_v61 = vadd.f32 -0.28449672, %v1117_v11  ;;  %v1087_v55 = vadd.f32 1.4214138, %v1055_v29  ;;  %2227 = vrcp.f32 %v930_v62  ;;  %v1401_v60 = vmul.f32 %v2994_v54, %v1241_v28 }
 0x213   : > { %v3074_v2 = vpop.f32.mrb[21].mxu0  ;;  %v1150_v57 = vadd.f32 -0.28449672, %v1118_v20  ;;  %v1281_v29 = vsub.f32 0.0, %v2992_v0  ;;  %v1024_v20 = vadd.f32 -1.4531521, %v992_v38  ;;  %v1243_v15 = vmul.f32 %v2953_v26, %v1211_v13  ;;  %v2222_v44 = vpop.eup %2221 }
 0x214   : > { %v3077_v9 = vpop.f32.mrb[22].mxu0  ;;  %v1181_v11 = vmul.f32 %v3003_v21, %v1149_v61  ;;  %v1119_v5 = vmul.f32 %v3030_v37, %v1087_v55  ;;  %v993_v14 = vmul.f32 1.0614054, %v3083_v19  ;;  %v3094_v34 = vmul.f32 0.70710677, %v3072_v51 }
 0x215   : > { %v3089_v7 = vpop.f32.mrb[23].mxu0  ;;  %v1182_v42 = vmul.f32 %v3009_v56, %v1150_v57  ;;  %v3956_v28 = vmov 1.0   ;;  %v1056_v12 = vmul.f32 %v3067_v47, %v1024_v20  ;;  %v1351_v57 = vmul.f32 1.442695, %v1312_v17 }
 0x216   : > { %3955 = vst [vmem:[#allocation20_spill] sm:$0xff] %v3089_v7  ;;  %v1213_v62 = vadd.f32 0.2548296, %v1181_v11  ;;  %v1151_v54 = vadd.f32 -0.28449672, %v1119_v5  ;;  %v3100_v61 = vsel %vm801_vm6, -1.0, %v3956_v28  ;;  %v1313_v11 = vmul.f32 %v1281_v29, %v2992_v0 }
 0x217   : > { %v1025_v38 = vadd.f32 -1.4531521, %v993_v14  ;;  %v1433_v26 = vsub.f32 1.0, %v1401_v60  ;;  %v1214_v13 = vadd.f32 0.2548296, %v1182_v42  ;;  %v1282_v31 = vsub.f32 0.0, %v3053_v8  ;;  %v2224_v16 = vpop.eup %2223 }
 0x218   : > { %v867_v14 = vand.u32 2147483647, %v3094_v34  ;;  %v1403_v42 = vmul.f32 %v3040_v39, %v1243_v15  ;;  %v1245_v0 = vmul.f32 %v3003_v21, %v1213_v62  ;;  %v1183_v60 = vmul.f32 %v3030_v37, %v1151_v54 }
 0x219   : > { %v1057_v20 = vmul.f32 %v3083_v19, %v1025_v38  ;;  %v3125_v29 = vmul.f32 0.5, %v3000_v45  ;;  %2229 = vpow2.f32 %v1351_v57  ;;  %v1465_v24 = vmul.f32 %v1433_v26, %v2916_v41 }
 0x21a   : > { %v3102_v55 = vpop.f32.mrb[24].mxu0  ;;  %v1353_v7 = vmul.f32 1.442695, %v1313_v11  ;;  %vm802_vm7 = vcmp.lt.f32.partialorder %v3025_v63, 0.0  ;;  %v1314_v39 = vmul.f32 %v1282_v31, %v3053_v8  ;;  %v1246_v21 = vmul.f32 %v3009_v56, %v1214_v13 }
 0x21b   : > { %3957 = vst [vmem:[#allocation21_spill] sm:$0xff] %v3102_v55  ;;  %v3107_v23 = vpop.f32.mrb[25].mxu0  ;;  %v1088_v55 = vadd.f32 1.4214138, %v1056_v12  ;;  %v1089_v38 = vadd.f32 1.4214138, %v1057_v20  ;;  %v1405_v57 = vmul.f32 %v2222_v44, %v1245_v0 }
 0x21c   : > { %3958 = vst [vmem:[#allocation22_spill] sm:$0xff] %v3107_v23  ;;  %v3111_v5 = vpop.f32.mrb[26].mxu0  ;;  %v2226_v23 = vpop.eup %2225  ;;  %v1215_v20 = vadd.f32 0.2548296, %v1183_v60  ;;  %v772_v11 = vmul.f32 0.70710677, %v677_v36  ;;  %v1406_v31 = vmul.f32 %v2224_v16, %v1246_v21 }
 0x21d   : > { %3959 = vst [vmem:[#allocation23_spill] sm:$0xff] %v3111_v5  ;;  %v3119_v17 = vpop.f32.mrb[27].mxu0  ;;  %v1120_v12 = vmul.f32 %v3067_v47, %v1088_v55  ;;  %v899_v5 = vmul.f32 0.3275911, %v867_v14  ;;  %v3131_v15 = vpop.eup %2227  ;;  %v1121_v45 = vmul.f32 %v3083_v19, %v1089_v38  ;;  %v1435_v55 = vsub.f32 1.0, %v1403_v42 }
 0x21e   : > { %3960 = vst [vmem:[#allocation24_spill] sm:$0xff] %v3119_v17  ;;  %v994_v17 = vmul.f32 1.0614054, %v3131_v15  ;;  %v3140_v8 = vsel %vm802_vm7, -1.0, %v3956_v28  ;;  %v3143_v13 = vmul.f32 0.5, %v3072_v51  ;;  %v1437_v0 = vsub.f32 1.0, %v1405_v57 }
 0x21f   : > { %v1152_v62 = vadd.f32 -0.28449672, %v1120_v12  ;;  %v931_v54 = vadd.f32 1.0, %v899_v5  ;;  %v1153_v26 = vadd.f32 -0.28449672, %v1121_v45  ;;  %v1247_v60 = vmul.f32 %v3030_v37, %v1215_v20 }
 0x220   : > { %v1026_v56 = vadd.f32 -1.4531521, %v994_v17  ;;  %v1355_v42 = vmul.f32 1.442695, %v1314_v39  ;;  %v1497_v38 = vadd.f32 1.0, %v1465_v24  ;;  %v1467_v63 = vmul.f32 %v1435_v55, %v2947_v4 }
 0x221   : > { %v1184_v41 = vmul.f32 %v3067_v47, %v1152_v62  ;;  %2231 = vrcp.f32 %v931_v54  ;;  %v1185_v5 = vmul.f32 %v3083_v19, %v1153_v26  ;;  %v1283_v62 = vsub.f32 0.0, %v867_v14 }
 0x222   : > { %2233 = vpow2.f32 %v1353_v7  ;;  %v1058_v12 = vmul.f32 %v3131_v15, %v1026_v56  ;;  %v3148_v7 = vmul.f32 0.5, %v677_v36  ;;  %v868_v17 = vand.u32 2147483647, %v772_v11 }
 0x223   : > { %v1216_v44 = vadd.f32 0.2548296, %v1184_v41  ;;  %v1217_v45 = vadd.f32 0.2548296, %v1185_v5  ;;  %v3153_v21 = vmul.f32 0.70710677, %v3117_v46  ;;  %v2230_v39 = vpop.eup %2229  ;;  %2235 = vpow2.f32 %v1355_v42 }
 0x224   : > { %v1090_v16 = vadd.f32 1.4214138, %v1058_v12  ;;  %v1438_v54 = vsub.f32 1.0, %v1406_v31  ;;  %vm803_vm8 = vcmp.lt.f32.partialorder %v3094_v34, 0.0  ;;  %v900_v37 = vmul.f32 0.3275911, %v868_v17 }
 0x225   : > { %v1248_v51 = vmul.f32 %v3067_v47, %v1216_v44  ;;  %v1469_v36 = vmul.f32 %v1437_v0, %v2989_v52  ;;  %v1407_v24 = vmul.f32 %v2226_v23, %v1247_v60  ;;  %v869_v55 = vand.u32 2147483647, %v3153_v21 }
 0x226   : > { %v1122_v4 = vmul.f32 %v3131_v15, %v1090_v16  ;;  %v3160_v47 = vmul.f32 %v1497_v38, %v2906_v1  ;;  %v1499_v57 = vadd.f32 1.0, %v1467_v63  ;;  %v1315_v20 = vmul.f32 %v1283_v62, %v867_v14 }
 0x227   : > { %v932_v41 = vadd.f32 1.0, %v900_v37  ;;  %v1408_v26 = vmul.f32 %v2230_v39, %v1248_v51  ;;  %v1249_v56 = vmul.f32 %v3083_v19, %v1217_v45  ;;  %v901_v44 = vmul.f32 0.3275911, %v869_v55 }
 0x228   : > { %v1154_v31 = vadd.f32 -0.28449672, %v1122_v4  ;;  %v1470_v52 = vmul.f32 %v1438_v54, %v3021_v59  ;;  %v3169_v23 = vsel %vm803_vm8, -1.0, %v3956_v28  ;;  %vm804_vm9 = vcmp.lt.f32.partialorder %v772_v11, 0.0 }
 0x229   : > { %2237 = vrcp.f32 %v932_v41  ;;  %v1501_v42 = vadd.f32 1.0, %v1469_v36  ;;  %v1439_v14 = vsub.f32 1.0, %v1407_v24  ;;  %v933_v60 = vadd.f32 1.0, %v901_v44 }
 0x22a   : > { %v1186_v19 = vmul.f32 %v3131_v15, %v1154_v31  ;;  %v1357_v12 = vmul.f32 1.442695, %v1315_v20  ;;  %v1284_v38 = vsub.f32 0.0, %v868_v17  ;;  %v683_v59 = vadd.f32 %v2958_v22, %v2882_v6 }
 0x22b   : > { %v3163_v5 = vpop.eup %2231  ;;  %v1440_v63 = vsub.f32 1.0, %v1408_v26  ;;  %2239 = vrcp.f32 %v933_v60  ;;  %v3176_v51 = vmul.f32 %v1499_v57, %v2920_v58  ;;  %v1502_v45 = vadd.f32 1.0, %v1470_v52 }
 0x22c   : > { %v2234_v1 = vpop.eup %2233  ;;  %v995_v0 = vmul.f32 1.0614054, %v3163_v5  ;;  %v3180_v16 = vsel %vm804_vm9, -1.0, %v3956_v28  ;;  %v3182_v39 = vmul.f32 0.70710677, %v683_v59  ;;  %v3185_v54 = vmul.f32 %v1501_v42, %v2962_v30 }
 0x22d   : > { %v1409_v62 = vmul.f32 %v2234_v1, %v1249_v56  ;;  %v1471_v37 = vmul.f32 %v1439_v14, %v3035_v53  ;;  %v3191_v36 = vadd.f32 %v2967_v32, %v2880_v3  ;;  %v2236_v58 = vpop.eup %2235  ;;  %v1218_v24 = vadd.f32 0.2548296, %v1186_v19 }
 0x22e   : > { %v1027_v34 = vadd.f32 -1.4531521, %v995_v0  ;;  %3961 = vst [vmem:[#allocation25_spill] sm:$0xff] %v3185_v54  ;;  %2241 = vpow2.f32 %v1357_v12  ;;  %v1316_v4 = vmul.f32 %v1284_v38, %v868_v17  ;;  %v3194_v11 = vand.u32 2147483647, %v3182_v39 }
 0x22f   : > { %v1472_v57 = vmul.f32 %v1440_v63, %v3063_v25  ;;  %v1441_v20 = vsub.f32 1.0, %v1409_v62  ;;  %v1285_v41 = vsub.f32 0.0, %v869_v55  ;;  %v3198_v53 = vmul.f32 %v1502_v45, %v2970_v33 }
 0x230   : > { %v1059_v22 = vmul.f32 %v3163_v5, %v1027_v34  ;;  %v902_v26 = vmul.f32 0.3275911, %v3194_v11  ;;  %v3202_v32 = vmul.f32 0.70710677, %v3191_v36  ;;  %v3206_v56 = vadd.f32 %v2975_v40, %v2882_v6 }
 0x231   : > { %v1503_v17 = vadd.f32 1.0, %v1471_v37  ;;  %v3210_v25 = vmul.f32 0.5, %v3117_v46  ;;  %vm805_vm10 = vcmp.lt.f32.partialorder %v3153_v21, 0.0  ;;  %v1250_v33 = vmul.f32 %v3131_v15, %v1218_v24 }
 0x232   : > { %v1091_v30 = vadd.f32 1.4214138, %v1059_v22  ;;  %v1359_v52 = vmul.f32 1.442695, %v1316_v4  ;;  %v934_v1 = vadd.f32 1.0, %v902_v26  ;;  %v1504_v14 = vadd.f32 1.0, %v1472_v57 }
 0x233   : > { %v3213_v44 = vpop.eup %2237  ;;  %v871_v42 = vand.u32 2147483647, %v3202_v32  ;;  %v1473_v40 = vmul.f32 %v1441_v20, %v3100_v61  ;;  %v1317_v60 = vmul.f32 %v1285_v41, %v869_v55  ;;  %v3220_v12 = vmul.f32 0.70710677, %v3206_v56  ;;  %v3236_v55 = vpop.f32.mrb[28].mxu0 }
 0x234   : > { %v1123_v31 = vmul.f32 %v3163_v5, %v1091_v30  ;;  %v996_v0 = vmul.f32 1.0614054, %v3213_v44  ;;  %2243 = vrcp.f32 %v934_v1  ;;  %v3225_v15 = vmul.f32 %v1503_v17, %v2979_v35 }
 0x235   : > { %v903_v46 = vmul.f32 0.3275911, %v871_v42  ;;  %v3222_v38 = vpop.eup %2239  ;;  %v3230_v62 = vsel %vm805_vm10, -1.0, %v3956_v28  ;;  %v3234_v61 = vadd.f32 %v3007_v10, %v2880_v3  ;;  %v1410_v34 = vmul.f32 %v2236_v58, %v1250_v33  ;;  %v3256_v33 = vpop.f32.mrb[29].mxu0 }
 0x236   : > { %v1155_v19 = vadd.f32 -0.28449672, %v1123_v31  ;;  %3962 = vst [vmem:[#allocation26_spill] sm:$0xff] %v3225_v15  ;;  %v1028_v63 = vadd.f32 -1.4531521, %v996_v0  ;;  %2245 = vpow2.f32 %v1359_v52  ;;  %v3240_v35 = vmul.f32 %v1504_v14, %v3038_v49  ;;  %v3260_v14 = vpop.f32.mrb[30].mxu0 }
 0x237   : > { %v997_v45 = vmul.f32 1.0614054, %v3222_v38  ;;  %v935_v37 = vadd.f32 1.0, %v903_v46  ;;  %v1505_v22 = vadd.f32 1.0, %v1473_v40  ;;  %v1361_v21 = vmul.f32 1.442695, %v1317_v60 }
 0x238   : > { %v1060_v24 = vmul.f32 %v3213_v44, %v1028_v63  ;;  %v2242_v4 = vpop.eup %2241  ;;  %v1187_v57 = vmul.f32 %v3163_v5, %v1155_v19  ;;  %v3245_v10 = vand.u32 2147483647, %v3220_v12  ;;  %v3247_v30 = vmul.f32 0.5, %v683_v59  ;;  %v3265_v46 = vpop.f32.mrb[31].mxu0 }
 0x239   : > { %v1029_v20 = vadd.f32 -1.4531521, %v997_v45  ;;  %2247 = vrcp.f32 %v935_v37  ;;  %v1286_v41 = vsub.f32 0.0, %v3194_v11  ;;  %v3251_v49 = vmul.f32 0.70710677, %v3234_v61 }
 0x23a   : > { %v1092_v58 = vadd.f32 1.4214138, %v1060_v24  ;;  %v1442_v26 = vsub.f32 1.0, %v1410_v34  ;;  %vm806_vm11 = vcmp.lt.f32.partialorder %v3182_v39, 0.0  ;;  %v904_v31 = vmul.f32 0.3275911, %v3245_v10 }
 0x23b   : > { %v1061_v17 = vmul.f32 %v3222_v38, %v1029_v20  ;;  %2249 = vpow2.f32 %v1361_v21  ;;  %v1287_v1 = vsub.f32 0.0, %v871_v42  ;;  %v873_v59 = vand.u32 2147483647, %v3251_v49 }
 0x23c   : > { %v1124_v52 = vmul.f32 %v3213_v44, %v1092_v58  ;;  %v3263_v40 = vmul.f32 %v1505_v22, %v3045_v48  ;;  %v1219_v0 = vadd.f32 0.2548296, %v1187_v57  ;;  %v936_v19 = vadd.f32 1.0, %v904_v31 }
 0x23d   : > { %v1093_v60 = vadd.f32 1.4214138, %v1061_v17  ;;  %v3268_v63 = vsel %vm806_vm11, -1.0, %v3956_v28  ;;  %v1318_v34 = vmul.f32 %v1286_v41, %v3194_v11  ;;  %v905_v45 = vmul.f32 0.3275911, %v873_v59 }
 0x23e   : > { %3963 = vst [vmem:[#allocation27_spill] sm:$0xff] %v3263_v40  ;;  %v1156_v39 = vadd.f32 -0.28449672, %v1124_v52  ;;  %v3271_v37 = vpop.eup %2243  ;;  %v1474_v24 = vmul.f32 %v1442_v26, %v3140_v8  ;;  %2251 = vrcp.f32 %v936_v19  ;;  %v3277_v48 = vadd.f32 %v3014_v27, %v2882_v6 }
 0x23f   : > { %v1125_v21 = vmul.f32 %v3222_v38, %v1093_v60  ;;  %v998_v22 = vmul.f32 1.0614054, %v3271_v37  ;;  %vm807_vm12 = vcmp.lt.f32.partialorder %v3202_v32, 0.0  ;;  %v1319_v57 = vmul.f32 %v1287_v1, %v871_v42 }
 0x240   : > { %v937_v20 = vadd.f32 1.0, %v905_v45  ;;  %v2246_v58 = vpop.eup %2245  ;;  %v1251_v11 = vmul.f32 %v3163_v5, %v1219_v0  ;;  %v3283_v17 = vmul.f32 0.5, %v3191_v36  ;;  %v3286_v8 = vmul.f32 0.5, %v3206_v56 }
 0x241   : > { %v1157_v41 = vadd.f32 -0.28449672, %v1125_v21  ;;  %v1188_v26 = vmul.f32 %v3213_v44, %v1156_v39  ;;  %v1030_v27 = vadd.f32 -1.4531521, %v998_v22  ;;  %v1363_v31 = vmul.f32 1.442695, %v1318_v34 }
 0x242   : > { %2253 = vrcp.f32 %v937_v20  ;;  %v1506_v32 = vadd.f32 1.0, %v1474_v24  ;;  %v3292_v42 = vsel %vm807_vm12, -1.0, %v3956_v28  ;;  %vm808_vm13 = vcmp.lt.f32.partialorder %v3220_v12, 0.0 }
 0x243   : > { %v3289_v52 = vpop.eup %2247  ;;  %v3296_v5 = vmul.f32 0.70710677, %v3277_v48  ;;  %v1062_v36 = vmul.f32 %v3271_v37, %v1030_v27  ;;  %v1365_v1 = vmul.f32 1.442695, %v1319_v57  ;;  %v1288_v0 = vsub.f32 0.0, %v3245_v10 }
 0x244   : > { %v999_v56 = vmul.f32 1.0614054, %v3289_v52  ;;  %v1411_v60 = vmul.f32 %v2242_v4, %v1251_v11  ;;  %v1189_v19 = vmul.f32 %v3222_v38, %v1157_v41  ;;  %v1289_v39 = vsub.f32 0.0, %v873_v59 }
 0x245   : > { %v3303_v34 = vand.u32 2147483647, %v3296_v5  ;;  %v2250_v45 = vpop.eup %2249  ;;  %v1220_v24 = vadd.f32 0.2548296, %v1188_v26  ;;  %v1094_v21 = vadd.f32 1.4214138, %v1062_v36  ;;  %2255 = vpow2.f32 %v1363_v31 }
 0x246   : > { %v1031_v22 = vadd.f32 -1.4531521, %v999_v56  ;;  %v3306_v20 = vmul.f32 %v1506_v32, %v3125_v29  ;;  %v3311_v57 = vsel %vm808_vm13, -1.0, %v3956_v28  ;;  %v3316_v11 = vadd.f32 %v3027_v43, %v2880_v3 }
 0x247   : > { %v906_v4 = vmul.f32 0.3275911, %v3303_v34  ;;  %v1126_v41 = vmul.f32 %v3271_v37, %v1094_v21  ;;  %2257 = vpow2.f32 %v1365_v1  ;;  %v1320_v27 = vmul.f32 %v1288_v0, %v3245_v10 }
 0x248   : > { %3964 = vst [vmem:[#allocation28_spill] sm:$0xff] %v3306_v20  ;;  %v1063_v26 = vmul.f32 %v3289_v52, %v1031_v22  ;;  %v3321_v29 = vpop.eup %2251  ;;  %v1443_v31 = vsub.f32 1.0, %v1411_v60  ;;  %v1221_v32 = vadd.f32 0.2548296, %v1189_v19  ;;  %v1321_v12 = vmul.f32 %v1289_v39, %v873_v59 }
 0x249   : > { %v938_v36 = vadd.f32 1.0, %v906_v4  ;;  %v1252_v56 = vmul.f32 %v3213_v44, %v1220_v24  ;;  %v1158_v40 = vadd.f32 -0.28449672, %v1126_v41  ;;  %v1000_v43 = vmul.f32 1.0614054, %v3321_v29 }
 0x24a   : > { %v1095_v20 = vadd.f32 1.4214138, %v1063_v26  ;;  %v3326_v15 = vmul.f32 0.5, %v3234_v61  ;;  %vm809_vm14 = vcmp.lt.f32.partialorder %v3251_v49, 0.0  ;;  %v3330_v10 = vmul.f32 0.70710677, %v3316_v11 }
 0x24b   : > { %2259 = vrcp.f32 %v938_v36  ;;  %v1190_v59 = vmul.f32 %v3271_v37, %v1158_v40  ;;  %v1032_v44 = vadd.f32 -1.4531521, %v1000_v43  ;;  %v3338_v60 = vadd.f32 %v3047_v18, %v2882_v6 }
 0x24c   : > { %v3332_v1 = vpop.eup %2253  ;;  %v1127_v0 = vmul.f32 %v3289_v52, %v1095_v20  ;;  %v1475_v61 = vmul.f32 %v1443_v31, %v3169_v23  ;;  %v1367_v19 = vmul.f32 1.442695, %v1320_v27  ;;  %v1369_v24 = vmul.f32 1.442695, %v1321_v12 }
 0x24d   : > { %v1001_v39 = vmul.f32 1.0614054, %v3332_v1  ;;  %v1412_v21 = vmul.f32 %v2246_v58, %v1252_v56  ;;  %v1253_v22 = vmul.f32 %v3222_v38, %v1221_v32  ;;  %v1064_v41 = vmul.f32 %v3321_v29, %v1032_v44 }
 0x24e   : > { %v1159_v4 = vadd.f32 -0.28449672, %v1127_v0  ;;  %v3347_v40 = vsel %vm809_vm14, -1.0, %v3956_v28  ;;  %v1290_v18 = vsub.f32 0.0, %v3303_v34  ;;  %v3351_v23 = vand.u32 2147483647, %v3330_v10 }
 0x24f   : > { %v1033_v20 = vadd.f32 -1.4531521, %v1001_v39  ;;  %v2256_v26 = vpop.eup %2255  ;;  %v1222_v27 = vadd.f32 0.2548296, %v1190_v59  ;;  %v1096_v31 = vadd.f32 1.4214138, %v1064_v41  ;;  %2261 = vpow2.f32 %v1367_v19 }
 0x250   : > { %v1191_v58 = vmul.f32 %v3289_v52, %v1159_v4  ;;  %v3355_v38 = vmul.f32 0.70710677, %v3338_v60  ;;  %v1507_v32 = vadd.f32 1.0, %v1475_v61  ;;  %v907_v12 = vmul.f32 0.3275911, %v3351_v23 }
 0x251   : > { %v1065_v49 = vmul.f32 %v3332_v1, %v1033_v20  ;;  %v2258_v36 = vpop.eup %2257  ;;  %v1444_v56 = vsub.f32 1.0, %v1412_v21  ;;  %v1413_v43 = vmul.f32 %v2250_v45, %v1253_v22  ;;  %v1128_v0 = vmul.f32 %v3321_v29, %v1096_v31 }
 0x252   : > { %v3361_v44 = vmul.f32 0.5, %v3277_v48  ;;  %v1223_v59 = vadd.f32 0.2548296, %v1191_v58  ;;  %2263 = vpow2.f32 %v1369_v24  ;;  %v939_v4 = vadd.f32 1.0, %v907_v12 }
 0x253   : > { %v1097_v39 = vadd.f32 1.4214138, %v1065_v49  ;;  %v1254_v41 = vmul.f32 %v3271_v37, %v1222_v27  ;;  %v1160_v61 = vadd.f32 -0.28449672, %v1128_v0  ;;  %v1322_v19 = vmul.f32 %v1290_v18, %v3303_v34 }
 0x254   : > { %v876_v20 = vand.u32 2147483647, %v3355_v38  ;;  %v3369_v45 = vmul.f32 %v1507_v32, %v3143_v13  ;;  %vm810_vm15 = vcmp.lt.f32.partialorder %v3296_v5, 0.0  ;;  %2265 = vrcp.f32 %v939_v4 }
 0x255   : > { %v3366_v54 = vpop.eup %2259  ;;  %v1129_v21 = vmul.f32 %v3332_v1, %v1097_v39  ;;  %v1476_v48 = vmul.f32 %v1444_v56, %v3180_v16  ;;  %v1445_v24 = vsub.f32 1.0, %v1413_v43  ;;  %v1192_v37 = vmul.f32 %v3321_v29, %v1160_v61 }
 0x256   : > { %v1002_v22 = vmul.f32 1.0614054, %v3366_v54  ;;  %v1255_v34 = vmul.f32 %v3289_v52, %v1223_v59  ;;  %v908_v27 = vmul.f32 0.3275911, %v876_v20  ;;  %v3379_v13 = vadd.f32 %v3065_v50, %v2880_v3 }
 0x257   : > { %v1161_v18 = vadd.f32 -0.28449672, %v1129_v21  ;;  %v1414_v58 = vmul.f32 %v2256_v26, %v1254_v41  ;;  %v3382_v31 = vsel %vm810_vm15, -1.0, %v3956_v28  ;;  %v1371_v32 = vmul.f32 1.442695, %v1322_v19 }
 0x258   : > { %v1034_v5 = vadd.f32 -1.4531521, %v1002_v22  ;;  %v1224_v16 = vadd.f32 0.2548296, %v1192_v37  ;;  %v3385_v49 = vmul.f32 0.5, %v3316_v11  ;;  %vm811_vm0 = vcmp.lt.f32.partialorder %v3330_v10, 0.0 }
 0x259   : > { %v940_v12 = vadd.f32 1.0, %v908_v27  ;;  %v1508_v52 = vadd.f32 1.0, %v1476_v48  ;;  %v1477_v56 = vmul.f32 %v1445_v24, %v3230_v62  ;;  %v1291_v50 = vsub.f32 0.0, %v3351_v23  ;;  %v2262_v26 = vpop.eup %2261 }
 0x25a   : > { %v1066_v43 = vmul.f32 %v3366_v54, %v1034_v5  ;;  %v1415_v0 = vmul.f32 %v2258_v36, %v1255_v34  ;;  %v1193_v59 = vmul.f32 %v3332_v1, %v1161_v18  ;;  %v3393_v39 = vmul.f32 0.70710677, %v3379_v13 }
 0x25b   : > { %2267 = vrcp.f32 %v940_v12  ;;  %v1446_v11 = vsub.f32 1.0, %v1414_v58  ;;  %v3397_v41 = vadd.f32 %v3074_v2, %v2882_v6  ;;  %v1256_v61 = vmul.f32 %v3321_v29, %v1224_v16 }
 0x25c   : > { %v1098_v4 = vadd.f32 1.4214138, %v1066_v43  ;;  %2269 = vpow2.f32 %v1371_v32  ;;  %v2264_v62 = vpop.eup %2263  ;;  %v3403_v36 = vsel %vm811_vm0, -1.0, %v3956_v28  ;;  %v1292_v19 = vsub.f32 0.0, %v876_v20 }
 0x25d   : > { %v877_v21 = vand.u32 2147483647, %v3393_v39  ;;  %v3407_v48 = vmul.f32 %v1508_v52, %v3148_v7  ;;  %v1509_v24 = vadd.f32 1.0, %v1477_v56  ;;  %v1323_v2 = vmul.f32 %v1291_v50, %v3351_v23 }
 0x25e   : > { %v1130_v37 = vmul.f32 %v3366_v54, %v1098_v4  ;;  %v3411_v22 = vpop.eup %2265  ;;  %v1447_v34 = vsub.f32 1.0, %v1415_v0  ;;  %v1225_v29 = vadd.f32 0.2548296, %v1193_v59  ;;  %vm812_vm1 = vcmp.lt.f32.partialorder %v3355_v38, 0.0 }
 0x25f   : > { %v909_v10 = vmul.f32 0.3275911, %v877_v21  ;;  %v1478_v18 = vmul.f32 %v1446_v11, %v3268_v63  ;;  %v1003_v58 = vmul.f32 1.0614054, %v3411_v22  ;;  %v3417_v7 = vmul.f32 0.70710677, %v3397_v41 }
 0x260   : > { %v1162_v27 = vadd.f32 -0.28449672, %v1130_v37  ;;  %v1416_v5 = vmul.f32 %v2262_v26, %v1256_v61  ;;  %v1324_v32 = vmul.f32 %v1292_v19, %v876_v20  ;;  %v3421_v23 = vadd.f32 %v3077_v9, %v2880_v3 }
 0x261   : > { %v941_v16 = vadd.f32 1.0, %v909_v10  ;;  %v3424_v12 = vmul.f32 %v1509_v24, %v3210_v25  ;;  %v1035_v52 = vadd.f32 -1.4531521, %v1003_v58  ;;  %v1373_v56 = vmul.f32 1.442695, %v1323_v2 }
 0x262   : > { %v3427_v63 = vmul.f32 0.5, %v3338_v60  ;;  %v1479_v43 = vmul.f32 %v1447_v34, %v3292_v42  ;;  %v1194_v50 = vmul.f32 %v3366_v54, %v1162_v27  ;;  %v3434_v20 = vsel %vm812_vm1, -1.0, %v3956_v28 }
 0x263   : > { %2271 = vrcp.f32 %v941_v16  ;;  %v1510_v9 = vadd.f32 1.0, %v1478_v18  ;;  %v1257_v26 = vmul.f32 %v3332_v1, %v1225_v29  ;;  %v1067_v25 = vmul.f32 %v3411_v22, %v1035_v52 }
 0x264   : > { %v3439_v0 = vand.u32 2147483647, %v3417_v7  ;;  %v1448_v59 = vsub.f32 1.0, %v1416_v5  ;;  %v1375_v42 = vmul.f32 1.442695, %v1324_v32  ;;  %v1293_v11 = vsub.f32 0.0, %v877_v21 }
 0x265   : > { %v3441_v60 = vpop.eup %2267  ;;  %v3444_v4 = vmul.f32 0.70710677, %v3421_v23  ;;  %v1099_v61 = vadd.f32 1.4214138, %v1067_v25  ;;  %2273 = vpow2.f32 %v1373_v56  ;;  %v1511_v24 = vadd.f32 1.0, %v1479_v43  ;;  %v3965_v43 = vld [vmem:[#allocation20_spill] sm:$0xff] }
 0x266   : > { %v2270_v38 = vpop.eup %2269  ;;  %v1004_v19 = vmul.f32 1.0614054, %v3441_v60  ;;  %v910_v1 = vmul.f32 0.3275911, %v3439_v0  ;;  %v1226_v37 = vadd.f32 0.2548296, %v1194_v50  ;;  %v1417_v29 = vmul.f32 %v2264_v62, %v1257_v26 }
 0x267   : > { %v3449_v2 = vmul.f32 0.5, %v3379_v13  ;;  %v3452_v34 = vand.u32 2147483647, %v3444_v4  ;;  %v1131_v10 = vmul.f32 %v3411_v22, %v1099_v61  ;;  %v3456_v58 = vmul.f32 %v1510_v9, %v3247_v30  ;;  %v3967_v61 = vld [vmem:[#allocation21_spill] sm:$0xff] }
 0x268   : > { %v1036_v18 = vadd.f32 -1.4531521, %v1004_v19  ;;  %v942_v27 = vadd.f32 1.0, %v910_v1  ;;  %v1480_v5 = vmul.f32 %v1448_v59, %v3311_v57  ;;  %vm813_vm2 = vcmp.lt.f32.partialorder %v3393_v39, 0.0 }
 0x269   : > { %v911_v32 = vmul.f32 0.3275911, %v3452_v34  ;;  %v1163_v16 = vadd.f32 -0.28449672, %v1131_v10  ;;  %v1325_v52 = vmul.f32 %v1293_v11, %v877_v21  ;;  %v1258_v62 = vmul.f32 %v3366_v54, %v1226_v37 }
 0x26a   : > { %v1068_v13 = vmul.f32 %v3441_v60, %v1036_v18  ;;  %2275 = vrcp.f32 %v942_v27  ;;  %v3465_v50 = vadd.f32 %v3965_v43, %v2882_v6  ;;  %v3468_v30 = vmul.f32 %v1511_v24, %v3283_v17  ;;  %v3968_v43 = vld [vmem:[#allocation22_spill] sm:$0xff] }
 0x26b   : > { %2277 = vpow2.f32 %v1375_v42  ;;  %v943_v56 = vadd.f32 1.0, %v911_v32  ;;  %v1449_v57 = vsub.f32 1.0, %v1417_v29  ;;  %v1195_v9 = vmul.f32 %v3411_v22, %v1163_v16 }
 0x26c   : > { %3966 = vst [vmem:[#allocation20_spill] sm:$0xff] %v3468_v30  ;;  %v1100_v26 = vadd.f32 1.4214138, %v1068_v13  ;;  %v1512_v59 = vadd.f32 1.0, %v1480_v5  ;;  %v3476_v54 = vsel %vm813_vm2, -1.0, %v3956_v28  ;;  %vm814_vm3 = vcmp.lt.f32.partialorder %v3417_v7, 0.0 }
 0x26d   : > { %v3471_v25 = vpop.eup %2271  ;;  %v3480_v21 = vmul.f32 0.70710677, %v3465_v50  ;;  %v1377_v11 = vmul.f32 1.442695, %v1325_v52  ;;  %v3486_v19 = vadd.f32 %v3967_v61, %v2880_v3  ;;  %v1418_v1 = vmul.f32 %v2270_v38, %v1258_v62 }
 0x26e   : > { %v1132_v17 = vmul.f32 %v3441_v60, %v1100_v26  ;;  %v1005_v42 = vmul.f32 1.0614054, %v3471_v25  ;;  %v1227_v24 = vadd.f32 0.2548296, %v1195_v9  ;;  %2279 = vrcp.f32 %v943_v56 }
 0x26f   : > { %v3489_v39 = vand.u32 2147483647, %v3480_v21  ;;  %v2274_v37 = vpop.eup %2273  ;;  %v1481_v29 = vmul.f32 %v1449_v57, %v3347_v40  ;;  %v1294_v27 = vsub.f32 0.0, %v3439_v0  ;;  %v3494_v5 = vmul.f32 %v1512_v59, %v3286_v8 }
 0x270   : > { %v1164_v10 = vadd.f32 -0.28449672, %v1132_v17  ;;  %v1037_v18 = vadd.f32 -1.4531521, %v1005_v42  ;;  %v3497_v32 = vmul.f32 0.5, %v3397_v41  ;;  %v3502_v38 = vsel %vm814_vm3, -1.0, %v3956_v28 }
 0x271   : > { %v912_v16 = vmul.f32 0.3275911, %v3489_v39  ;;  %v1295_v52 = vsub.f32 0.0, %v3452_v34  ;;  %v3509_v62 = vmul.f32 0.70710677, %v3486_v19  ;;  %v1450_v8 = vsub.f32 1.0, %v1418_v1 }
 0x272   : > { %v1196_v13 = vmul.f32 %v3441_v60, %v1164_v10  ;;  %v1069_v40 = vmul.f32 %v3471_v25, %v1037_v18  ;;  %v1259_v41 = vmul.f32 %v3411_v22, %v1227_v24  ;;  %v3514_v7 = vadd.f32 %v3968_v43, %v2882_v6 }
 0x273   : > { %v944_v56 = vadd.f32 1.0, %v912_v16  ;;  %v1513_v9 = vadd.f32 1.0, %v1481_v29  ;;  %2281 = vpow2.f32 %v1377_v11  ;;  %v1326_v59 = vmul.f32 %v1294_v27, %v3439_v0 }
 0x274   : > { %v3516_v57 = vpop.eup %2275  ;;  %v1101_v26 = vadd.f32 1.4214138, %v1069_v40  ;;  %v1228_v42 = vadd.f32 0.2548296, %v1196_v13  ;;  %v3521_v1 = vmul.f32 0.5, %v3421_v23  ;;  %vm815_vm4 = vcmp.lt.f32.partialorder %v3444_v4, 0.0 }
 0x275   : > { %v2278_v17 = vpop.eup %2277  ;;  %v1006_v61 = vmul.f32 1.0614054, %v3516_v57  ;;  %2283 = vrcp.f32 %v944_v56  ;;  %v1327_v24 = vmul.f32 %v1295_v52, %v3452_v34  ;;  %v881_v29 = vand.u32 2147483647, %v3509_v62 }
 0x276   : > { %v1133_v22 = vmul.f32 %v3471_v25, %v1101_v26  ;;  %v1482_v11 = vmul.f32 %v1450_v8, %v3382_v31  ;;  %v1419_v10 = vmul.f32 %v2274_v37, %v1259_v41  ;;  %v3529_v18 = vmul.f32 0.70710677, %v3514_v7 }
 0x277   : > { %v1038_v0 = vadd.f32 -1.4531521, %v1006_v61  ;;  %v3532_v27 = vmul.f32 %v1513_v9, %v3326_v15  ;;  %v1379_v16 = vmul.f32 1.442695, %v1326_v59  ;;  %v913_v13 = vmul.f32 0.3275911, %v881_v29 }
 0x278   : > { %v1165_v23 = vadd.f32 -0.28449672, %v1133_v22  ;;  %v3534_v40 = vpop.eup %2279  ;;  %v1260_v4 = vmul.f32 %v3441_v60, %v1228_v42  ;;  %v3539_v52 = vsel %vm815_vm4, -1.0, %v3956_v28  ;;  %v882_v31 = vand.u32 2147483647, %v3529_v18 }
 0x279   : > { %3969 = vst [vmem:[#allocation21_spill] sm:$0xff] %v3532_v27  ;;  %v1070_v34 = vmul.f32 %v3516_v57, %v1038_v0  ;;  %v1007_v8 = vmul.f32 1.0614054, %v3534_v40  ;;  %v1381_v15 = vmul.f32 1.442695, %v1327_v24  ;;  %v1296_v41 = vsub.f32 0.0, %v3489_v39 }
 0x27a   : > { %v1197_v37 = vmul.f32 %v3471_v25, %v1165_v23  ;;  %v1514_v56 = vadd.f32 1.0, %v1482_v11  ;;  %v1451_v43 = vsub.f32 1.0, %v1419_v10  ;;  %v945_v26 = vadd.f32 1.0, %v913_v13  ;;  %v3970_v0 = vld [vmem:[#allocation23_spill] sm:$0xff] }
 0x27b   : > { %v1102_v9 = vadd.f32 1.4214138, %v1070_v34  ;;  %2285 = vpow2.f32 %v1379_v16  ;;  %v1039_v60 = vadd.f32 -1.4531521, %v1007_v8  ;;  %v914_v42 = vmul.f32 0.3275911, %v882_v31 }
 0x27c   : > { %v1229_v59 = vadd.f32 0.2548296, %v1197_v37  ;;  %v1420_v61 = vmul.f32 %v2278_v17, %v1260_v4  ;;  %2287 = vrcp.f32 %v945_v26  ;;  %v715_v23 = vadd.f32 %v3970_v0, %v2880_v3 }
 0x27d   : > { %v1134_v22 = vmul.f32 %v3516_v57, %v1102_v9  ;;  %v2282_v27 = vpop.eup %2281  ;;  %v3549_v24 = vmul.f32 0.5, %v3465_v50  ;;  %v1328_v11 = vmul.f32 %v1296_v41, %v3489_v39  ;;  %v1297_v10 = vsub.f32 0.0, %v881_v29 }
 0x27e   : > { %v946_v34 = vadd.f32 1.0, %v914_v42  ;;  %v3555_v16 = vmul.f32 %v1514_v56, %v3361_v44  ;;  %v1261_v17 = vmul.f32 %v3471_v25, %v1229_v59  ;;  %vm816_vm5 = vcmp.lt.f32.partialorder %v3480_v21, 0.0 }
 0x27f   : > { %v3552_v13 = vpop.eup %2283  ;;  %v3560_v4 = vmul.f32 0.5, %v3486_v19  ;;  %v1483_v37 = vmul.f32 %v1451_v43, %v3403_v36  ;;  %v1166_v50 = vadd.f32 -0.28449672, %v1134_v22  ;;  %v1071_v8 = vmul.f32 %v3534_v40, %v1039_v60  ;;  %v3972_v36 = vld [vmem:[#allocation24_spill] sm:$0xff] }
 0x280   : > { %3971 = vst [vmem:[#allocation22_spill] sm:$0xff] %v3555_v16  ;;  %v1008_v39 = vmul.f32 1.0614054, %v3552_v13  ;;  %v1452_v41 = vsub.f32 1.0, %v1420_v61  ;;  %2289 = vrcp.f32 %v946_v34  ;;  %v1298_v9 = vsub.f32 0.0, %v882_v31 }
 0x281   : > { %v787_v26 = vmul.f32 0.70710677, %v715_v23  ;;  %2291 = vpow2.f32 %v1381_v15  ;;  %v1383_v56 = vmul.f32 1.442695, %v1328_v11  ;;  %v1329_v25 = vmul.f32 %v1297_v10, %v881_v29 }
 0x282   : > { %v1040_v44 = vadd.f32 -1.4531521, %v1008_v39  ;;  %v1421_v59 = vmul.f32 %v2282_v27, %v1261_v17  ;;  %vm817_vm6 = vcmp.lt.f32.partialorder %v3509_v62, 0.0  ;;  %v717_v43 = vadd.f32 %v3972_v36, %v2882_v6 }
 0x283   : > { %v3566_v19 = vand.u32 2147483647, %v787_v26  ;;  %v1198_v60 = vmul.f32 %v3516_v57, %v1166_v50  ;;  %v1103_v42 = vadd.f32 1.4214138, %v1071_v8  ;;  %v3574_v61 = vsel %vm816_vm5, -1.0, %v3956_v28 }
 0x284   : > { %v1072_v15 = vmul.f32 %v3552_v13, %v1040_v44  ;;  %v1515_v22 = vadd.f32 1.0, %v1483_v37  ;;  %v1484_v29 = vmul.f32 %v1452_v41, %v3434_v20  ;;  %v1330_v27 = vmul.f32 %v1298_v9, %v882_v31  ;;  %v3973_v37 = vld [vmem:[#allocation12_spill] sm:$0xff] }
 0x285   : > { %v915_v62 = vmul.f32 0.3275911, %v3566_v19  ;;  %v2286_v0 = vpop.eup %2285  ;;  %2293 = vpow2.f32 %v1383_v56  ;;  %v3580_v10 = vsel %vm817_vm6, -1.0, %v3956_v28  ;;  %v1385_v34 = vmul.f32 1.442695, %v1329_v25 }
 0x286   : > { %v1104_v11 = vadd.f32 1.4214138, %v1072_v15  ;;  %v3582_v17 = vpop.eup %2287  ;;  %v1453_v21 = vsub.f32 1.0, %v1421_v59  ;;  %vm818_vm7 = vcmp.lt.f32.partialorder %v3529_v18, 0.0  ;;  %v3585_v8 = vmul.f32 0.70710677, %v717_v43 }
 0x287   : > { %v947_v50 = vadd.f32 1.0, %v915_v62  ;;  %vm794_vm8 = vcmp.lt.f32.partialorder %v3973_v37, 0.0  ;;  %v1230_v20 = vadd.f32 0.2548296, %v1198_v60  ;;  %v1135_v31 = vmul.f32 %v3534_v40, %v1103_v42 }
 0x288   : > { %v1009_v39 = vmul.f32 1.0614054, %v3582_v17  ;;  %v3591_v41 = vmul.f32 0.5, %v3514_v7  ;;  %v3594_v9 = vmul.f32 %v1515_v22, %v3385_v49  ;;  %v1516_v44 = vadd.f32 1.0, %v1484_v29 }
 0x289   : > { %v1387_v56 = vmul.f32 1.442695, %v1330_v27  ;;  %2295 = vrcp.f32 %v947_v50  ;;  %v1136_v18 = vmul.f32 %v3552_v13, %v1104_v11  ;;  %v3598_v59 = vsel %vm818_vm7, -1.0, %v3956_v28 }
 0x28a   : > { %3974 = vst [vmem:[#allocation23_spill] sm:$0xff] %v3594_v9  ;;  %v1041_v25 = vadd.f32 -1.4531521, %v1009_v39  ;;  %2297 = vpow2.f32 %v1385_v34  ;;  %v3600_v36 = vpop.eup %2289  ;;  %v1485_v60 = vmul.f32 %v1453_v21, %v3476_v54  ;;  %v3603_v42 = vmul.f32 0.5, %v715_v23  ;;  %v3976_v23 = vld [vmem:[#allocation16_spill] sm:$0xff]  ;;  %v3978_v9 = vld [vmem:[#allocation18_spill] sm:$0xff] }
 0x28b   : > { %vm819_vm9 = vcmp.lt.f32.partialorder %v787_v26, 0.0  ;;  %v3606_v49 = vand.u32 2147483647, %v3585_v8  ;;  %v3608_v7 = vpop.eup %2291  ;;  %v1262_v15 = vmul.f32 %v3516_v57, %v1230_v20  ;;  %v1167_v22 = vadd.f32 -0.28449672, %v1135_v31 }
 0x28c   : > { %v1073_v29 = vmul.f32 %v3582_v17, %v1041_v25  ;;  %v1010_v27 = vmul.f32 1.0614054, %v3600_v36  ;;  %v3614_v62 = vmul.f32 %v1516_v44, %v3427_v63  ;;  %2299 = vpow2.f32 %v1387_v56 }
 0x28d   : > { %v916_v54 = vmul.f32 0.3275911, %v3606_v49  ;;  %v986_v26 = vmul.f32 1.0614054, %v3976_v23  ;;  %v1168_v11 = vadd.f32 -0.28449672, %v1136_v18  ;;  %v1422_v63 = vmul.f32 %v2286_v0, %v1262_v15 }
 0x28e   : > { %3975 = vst [vmem:[#allocation24_spill] sm:$0xff] %v3614_v62  ;;  %v1105_v34 = vadd.f32 1.4214138, %v1073_v29  ;;  %v3619_v21 = vsel %vm819_vm9, -1.0, %v3956_v28  ;;  %v1299_v57 = vsub.f32 0.0, %v3566_v19  ;;  %v1517_v50 = vadd.f32 1.0, %v1485_v60 }
 0x28f   : > { %v1042_v20 = vadd.f32 -1.4531521, %v1010_v27  ;;  %v3622_v31 = vmul.f32 0.5, %v717_v43  ;;  %v948_v39 = vadd.f32 1.0, %v916_v54  ;;  %v2294_v25 = vpop.eup %2293  ;;  %v1199_v44 = vmul.f32 %v3534_v40, %v1167_v22 }
 0x290   : > { %v1137_v56 = vmul.f32 %v3582_v17, %v1105_v34  ;;  %v988_v62 = vmul.f32 1.0614054, %v3978_v9  ;;  %v1018_v29 = vadd.f32 -1.4531521, %v986_v26  ;;  %v3630_v16 = vadd.f32 %v3236_v55, %v2880_v3 }
 0x291   : > { %3977 = vst [vmem:[#allocation12_spill] sm:$0xff] %v3622_v31  ;;  %v1074_v18 = vmul.f32 %v3600_v36, %v1042_v20  ;;  %2301 = vrcp.f32 %v948_v39  ;;  %v1200_v43 = vmul.f32 %v3552_v13, %v1168_v11  ;;  %v1331_v27 = vmul.f32 %v1299_v57, %v3566_v19 }
 0x292   : > { %3979 = vst [vmem:[#allocation16_spill] sm:$0xff] %v3630_v16  ;;  %v1169_v60 = vadd.f32 -0.28449672, %v1137_v56  ;;  %v1020_v0 = vadd.f32 -1.4531521, %v988_v62  ;;  %v3637_v22 = vmul.f32 %v1517_v50, %v3449_v2  ;;  %v3642_v26 = vsel %vm794_vm8, -1.0, %v3956_v28 }
 0x293   : > { %v3634_v15 = vpop.eup %2295  ;;  %v1106_v54 = vadd.f32 1.4214138, %v1074_v18  ;;  %v1050_v55 = vmul.f32 %v3976_v23, %v1018_v29  ;;  %v1454_v20 = vsub.f32 1.0, %v1422_v63  ;;  %v1231_v11 = vadd.f32 0.2548296, %v1199_v44 }
 0x294   : > { %3980 = vst [vmem:[#allocation18_spill] sm:$0xff] %v3637_v22  ;;  %v2298_v34 = vpop.eup %2297  ;;  %v1201_v39 = vmul.f32 %v3582_v17, %v1169_v60  ;;  %v1011_v19 = vmul.f32 1.0614054, %v3634_v15  ;;  %v1052_v2 = vmul.f32 %v3978_v9, %v1020_v0  ;;  %v3650_v50 = vmul.f32 0.70710677, %v3630_v16 }
 0x295   : > { %v1138_v62 = vmul.f32 %v3600_v36, %v1106_v54  ;;  %v1082_v57 = vadd.f32 1.4214138, %v1050_v55  ;;  %v1232_v37 = vadd.f32 0.2548296, %v1200_v43  ;;  %v1300_v18 = vsub.f32 0.0, %v3606_v49  ;;  %v3982_v43 = vld [vmem:[#allocation13_spill] sm:$0xff] }
 0x296   : > { %3981 = vst [vmem:[#allocation29_spill] sm:$0xff] %v3650_v50  ;;  %v1043_v56 = vadd.f32 -1.4531521, %v1011_v19  ;;  %v2300_v44 = vpop.eup %2299  ;;  %v1389_v60 = vmul.f32 1.442695, %v1331_v27  ;;  %v1263_v54 = vmul.f32 %v3534_v40, %v1231_v11  ;;  %vm820_vm10 = vcmp.lt.f32.partialorder %v3585_v8, 0.0 }
 0x297   : > { %v1170_v29 = vadd.f32 -0.28449672, %v1138_v62  ;;  %v1084_v22 = vadd.f32 1.4214138, %v1052_v2  ;;  %v1114_v31 = vmul.f32 %v3976_v23, %v1082_v57  ;;  %v1233_v0 = vadd.f32 0.2548296, %v1201_v39 }
 0x298   : > { %v1075_v55 = vmul.f32 %v3634_v15, %v1043_v56  ;;  %vm796_vm11 = vcmp.lt.f32.partialorder %v3982_v43, 0.0  ;;  %v3663_v62 = vand.u32 2147483647, %v3650_v50  ;;  %v1486_v27 = vmul.f32 %v1454_v20, %v3502_v38 }
 0x299   : > { %v1202_v19 = vmul.f32 %v3600_v36, %v1170_v29  ;;  %v1116_v16 = vmul.f32 %v3978_v9, %v1084_v22  ;;  %v1146_v63 = vadd.f32 -0.28449672, %v1114_v31  ;;  %v1264_v2 = vmul.f32 %v3552_v13, %v1232_v37 }
 0x29a   : > { %v1107_v40 = vadd.f32 1.4214138, %v1075_v55  ;;  %v1332_v11 = vmul.f32 %v1300_v18, %v3606_v49  ;;  %2303 = vpow2.f32 %v1389_v60  ;;  %v917_v29 = vmul.f32 0.3275911, %v3663_v62 }
 0x29b   : > { %v3668_v39 = vpop.eup %2301  ;;  %v1148_v57 = vadd.f32 -0.28449672, %v1116_v16  ;;  %v1178_v56 = vmul.f32 %v3976_v23, %v1146_v63  ;;  %v1423_v31 = vmul.f32 %v3608_v7, %v1263_v54  ;;  %v1234_v22 = vadd.f32 0.2548296, %v1202_v19 }
 0x29c   : > { %v1139_v50 = vmul.f32 %v3634_v15, %v1107_v40  ;;  %v1012_v38 = vmul.f32 1.0614054, %v3668_v39  ;;  %v1265_v13 = vmul.f32 %v3582_v17, %v1233_v0  ;;  %v949_v37 = vadd.f32 1.0, %v917_v29 }
 0x29d   : > { %v1180_v20 = vmul.f32 %v3978_v9, %v1148_v57  ;;  %v1210_v49 = vadd.f32 0.2548296, %v1178_v56  ;;  %v1424_v18 = vmul.f32 %v2294_v25, %v1264_v2  ;;  %v1391_v55 = vmul.f32 1.442695, %v1332_v11  ;;  %v3983_v2 = vld [vmem:[#allocation17_spill] sm:$0xff]  ;;  %v3984_v56 = vld [vmem:[#allocation19_spill] sm:$0xff] }
 0x29e   : > { %v1171_v60 = vadd.f32 -0.28449672, %v1139_v50  ;;  %v1044_v16 = vadd.f32 -1.4531521, %v1012_v38  ;;  %2305 = vrcp.f32 %v949_v37  ;;  %v3680_v7 = vadd.f32 %v3256_v33, %v2882_v6 }
 0x29f   : > { %v1212_v63 = vadd.f32 0.2548296, %v1180_v20  ;;  %v1242_v30 = vmul.f32 %v3976_v23, %v1210_v49  ;;  %v1266_v54 = vmul.f32 %v3600_v36, %v1234_v22  ;;  %v3687_v0 = vsel %vm820_vm10, -1.0, %v3956_v28 }
 0x2a0   : > { %v1203_v17 = vmul.f32 %v3634_v15, %v1171_v60  ;;  %v1076_v25 = vmul.f32 %v3668_v39, %v1044_v16  ;;  %v1518_v50 = vadd.f32 1.0, %v1486_v27  ;;  %v1425_v19 = vmul.f32 %v2298_v34, %v1265_v13 }
 0x2a1   : > { %v1244_v23 = vmul.f32 %v3978_v9, %v1212_v63  ;;  %v1402_v40 = vmul.f32 %v3983_v2, %v1242_v30  ;;  %v1455_v11 = vsub.f32 1.0, %v1423_v31  ;;  %2307 = vpow2.f32 %v1391_v55 }
 0x2a2   : > { %v1235_v33 = vadd.f32 0.2548296, %v1203_v17  ;;  %v1108_v57 = vadd.f32 1.4214138, %v1076_v25  ;;  %v1456_v36 = vsub.f32 1.0, %v1424_v18  ;;  %v1426_v38 = vmul.f32 %v2300_v44, %v1266_v54 }
 0x2a3   : > { %v1404_v29 = vmul.f32 %v3984_v56, %v1244_v23  ;;  %v1434_v22 = vsub.f32 1.0, %v1402_v40  ;;  %v3694_v8 = vmul.f32 0.70710677, %v3680_v7  ;;  %v828_v30 = vsel %vm796_vm11, -1.0, %v3956_v28  ;;  %v3985_v40 = vld [vmem:[#allocation14_spill] sm:$0xff] }
 0x2a4   : > { %v1267_v20 = vmul.f32 %v3634_v15, %v1235_v33  ;;  %v1140_v34 = vmul.f32 %v3668_v39, %v1108_v57  ;;  %v2304_v9 = vpop.eup %2303  ;;  %v1457_v27 = vsub.f32 1.0, %v1425_v19  ;;  %v3704_v49 = vadd.f32 %v3260_v14, %v2880_v3  ;;  %v3986_v33 = vld [vmem:[#allocation15_spill] sm:$0xff] }
 0x2a5   : > { %v1436_v31 = vsub.f32 1.0, %v1404_v29  ;;  %v1466_v13 = vmul.f32 %v1434_v22, %v3642_v26  ;;  %v3707_v37 = vmul.f32 %v1518_v50, %v3497_v32  ;;  %v3710_v18 = vand.u32 2147483647, %v3694_v8 }
 0x2a6   : > { %v1427_v44 = vmul.f32 %v2304_v9, %v1267_v20  ;;  %v1172_v15 = vadd.f32 -0.28449672, %v1140_v34  ;;  %v1487_v43 = vmul.f32 %v1455_v11, %v3539_v52  ;;  %v1488_v60 = vmul.f32 %v1456_v36, %v3574_v61 }
 0x2a7   : > { %v1468_v16 = vmul.f32 %v1436_v31, %v828_v30  ;;  %v1498_v55 = vadd.f32 1.0, %v1466_v13  ;;  %v1458_v63 = vsub.f32 1.0, %v1426_v38  ;;  %v918_v3 = vmul.f32 0.3275911, %v3710_v18 }
 0x2a8   : > { %v1459_v26 = vsub.f32 1.0, %v1427_v44  ;;  %v1204_v54 = vmul.f32 %v3668_v39, %v1172_v15  ;;  %v3716_v14 = vpop.eup %2305  ;;  %v1489_v32 = vmul.f32 %v1457_v27, %v3580_v10  ;;  %v1301_v25 = vsub.f32 0.0, %v3663_v62 }
 0x2a9   : > { %v1500_v17 = vadd.f32 1.0, %v1468_v16  ;;  %v3721_v50 = vmul.f32 0.70710677, %v3704_v49  ;;  %v1013_v61 = vmul.f32 1.0614054, %v3716_v14  ;;  %v950_v19 = vadd.f32 1.0, %v918_v3 }
 0x2aa   : > { %v1236_v52 = vadd.f32 0.2548296, %v1204_v54  ;;  %v3726_v23 = vadd.f32 %v3265_v46, %v2882_v6  ;;  %v1491_v2 = vmul.f32 %v1459_v26, %v3619_v21  ;;  %v1530_v11 = vmul.f32 %v1498_v55, %v3985_v40  ;;  %v3989_v16 = vld [vmem:[#allocation26_spill] sm:$0xff]  ;;  %v3990_v26 = vld [vmem:[#allocation28_spill] sm:$0xff] }
 0x2ab   : > { %v1532_v10 = vmul.f32 %v1500_v17, %v3986_v33  ;;  %v3732_v57 = vand.u32 2147483647, %v3721_v50  ;;  %v2308_v36 = vpop.eup %2307  ;;  %v1490_v56 = vmul.f32 %v1458_v63, %v3598_v59  ;;  %v1045_v22 = vadd.f32 -1.4531521, %v1013_v61  ;;  %v3994_v40 = vld [vmem:[#allocation24_spill] sm:$0xff]  ;;  %v3996_v33 = vld [vmem:[#allocation23_spill] sm:$0xff] }
 0x2ac   : > { %v1268_v29 = vmul.f32 %v3668_v39, %v1236_v52  ;;  %2309 = vrcp.f32 %v950_v19  ;;  %v1519_v38 = vadd.f32 1.0, %v1487_v43  ;;  %v1520_v20 = vadd.f32 1.0, %v1488_v60  ;;  %v3988_v60 = vld [vmem:[#allocation25_spill] sm:$0xff]  ;;  %v3992_v52 = vld [vmem:[#allocation20_spill] sm:$0xff] }
 0x2ad   : > { %v1562_v6 = vpack.c.bf16 %v1532_v10, %v1530_v11  ;;  %v919_v46 = vmul.f32 0.3275911, %v3732_v57  ;;  %v1521_v21 = vadd.f32 1.0, %v1489_v32  ;;  %v1077_v30 = vmul.f32 %v3716_v14, %v1045_v22  ;;  %v3991_v32 = vld [vmem:[#allocation27_spill] sm:$0xff] }
 0x2ae   : > { %v1428_v34 = vmul.f32 %v2308_v36, %v1268_v29  ;;  %v1333_v9 = vmul.f32 %v1301_v25, %v3663_v62  ;;  %v1523_v27 = vadd.f32 1.0, %v1491_v2  ;;  %v3740_v59 = vmul.f32 0.70710677, %v3726_v23  ;;  %v3993_v2 = vld [vmem:[#allocation22_spill] sm:$0xff] }
 0x2af   : > { %1744 = vmatprep.mubr.bf16.mxu1 %v1562_v6  ;;  %v951_v31 = vadd.f32 1.0, %v919_v46  ;;  %v1564_v39 = vpack.c.bf16 %v3240_v35, %v3198_v53  ;;  %v1522_v13 = vadd.f32 1.0, %v1490_v56  ;;  %v1109_v15 = vadd.f32 1.4214138, %v1077_v30  ;;  %v3998_v56 = vld [vmem:[#allocation18_spill] sm:$0xff] }
 0x2b0   : > { %v1460_v44 = vsub.f32 1.0, %v1428_v34  ;;  %v3987_v43 = vpack.c.bf16 %v3176_v51, %v3160_v47  ;;  %v1563_v55 = vpack.c.bf16 %v3989_v16, %v3988_v60  ;;  %v3750_v62 = vmul.f32 %v1519_v38, %v3521_v1 }
 0x2b1   : > { %2311 = vrcp.f32 %v951_v31  ;;  %v888_v63 = vand.u32 2147483647, %v3740_v59  ;;  %v1566_v53 = vpack.c.bf16 %v3407_v48, %v3990_v26  ;;  %v3756_v35 = vmul.f32 %v1520_v20, %v3549_v24 }
 0x2b2   : > { %1745 = vmatmul.mubr.bf16.vlgmr.msra.gmra.mrb[0].mxu1 %v3987_v43  ;;  %v1492_v54 = vmul.f32 %v1460_v44, %v3687_v0  ;;  %v1141_v47 = vmul.f32 %v3716_v14, %v1109_v15  ;;  %v1393_v51 = vmul.f32 1.442695, %v1333_v9  ;;  %v3761_v3 = vmul.f32 %v1523_v27, %v3603_v42 }
 0x2b3   : > { %1752 = vmatprep.mubr.bf16.mxu1 %v1564_v39  ;;  %v920_v1 = vmul.f32 0.3275911, %v888_v63  ;;  %v1565_v17 = vpack.c.bf16 %v3369_v45, %v3991_v32  ;;  %v1568_v25 = vpack.c.bf16 %v3494_v5, %v3456_v58  ;;  %v3768_v48 = vmul.f32 %v1521_v21, %v3560_v4  ;;  %v3995_v45 = vld [vmem:[#allocation21_spill] sm:$0xff]  ;;  %v3997_v5 = vld [vmem:[#allocation12_spill] sm:$0xff] }
 0x2b4   : > { %v3771_v24 = vmul.f32 %v1522_v13, %v3591_v41  ;;  %v1524_v0 = vadd.f32 1.0, %v1492_v54  ;;  %v1567_v61 = vpack.c.bf16 %v3992_v52, %v3424_v12  ;;  %v1302_v42 = vsub.f32 0.0, %v3710_v18 }
 0x2b5   : > { %v952_v19 = vadd.f32 1.0, %v920_v1  ;;  %v1570_v11 = vpack.c.bf16 %v3994_v40, %v3993_v2  ;;  %v1569_v10 = vpack.c.bf16 %v3996_v33, %v3995_v45  ;;  %v1173_v36 = vadd.f32 -0.28449672, %v1141_v47 }
 0x2b6   : > { %v2310_v58 = vpop.eup %2309  ;;  %v3781_v4 = vmul.f32 %v1524_v0, %v3997_v5  ;;  %v1572_v41 = vpack.c.bf16 %v3756_v35, %v3707_v37  ;;  %v1571_v12 = vpack.c.bf16 %v3750_v62, %v3998_v56  ;;  %v1303_v22 = vsub.f32 0.0, %v3732_v57 }
 0x2b7   : > { %v1014_v29 = vmul.f32 1.0614054, %v2310_v58  ;;  %2313 = vrcp.f32 %v952_v19  ;;  %v1573_v38 = vpack.c.bf16 %v3761_v3, %v3768_v48  ;;  %v1334_v46 = vmul.f32 %v1302_v42, %v3710_v18 }
 0x2b8   : > { %v1574_v20 = vpack.c.bf16 %v3781_v4, %v3771_v24  ;;  %v1205_v21 = vmul.f32 %v3716_v14, %v1173_v36  ;;  %2315 = vpow2.f32 %v1393_v51  ;;  %v1335_v9 = vmul.f32 %v1303_v22, %v3732_v57  ;;  %v3826_v24 = vld [vmem:[%s3919_s4] ss:$0 sm:$0xff] }
 0x2b9   : > { %v1046_v6 = vadd.f32 -1.4531521, %v1014_v29  ;;  %v1395_v39 = vmul.f32 1.442695, %v1334_v46  ;;  %v1304_v13 = vsub.f32 0.0, %v888_v63  ;;  %vm823_vm13 = vcmp.lt.f32.partialorder %v3721_v50, 0.0 }
 0x2ba   : > { %1753 = vmatmul.mubr.bf16.gmra.mrb[4].mxu1 %v1563_v55  ;;  %v1237_v44 = vadd.f32 0.2548296, %v1205_v21  ;;  %v1397_v60 = vmul.f32 1.442695, %v1335_v9  ;;  %vm822_vm14 = vcmp.lt.f32.partialorder %v3694_v8, 0.0  ;;  %vm824_vm15 = vcmp.lt.f32.partialorder %v3740_v59, 0.0 }
 0x2bb   : > { %1760 = vmatprep.mubr.bf16.mxu1 %v1566_v53  ;;  %v2312_v34 = vpop.eup %2311  ;;  %v1078_v30 = vmul.f32 %v2310_v58, %v1046_v6  ;;  %2317 = vpow2.f32 %v1395_v39  ;;  %v1336_v26 = vmul.f32 %v1304_v13, %v888_v63  ;;  %v3999_v63 = vld [vmem:[#allocation29_spill] sm:$0xff]  ;;  %v854_v8 = vsel %vm822_vm14, -1.0, %v3956_v28 }
 0x2bc   : > { %v1015_v27 = vmul.f32 1.0614054, %v2312_v34  ;;  %v1269_v53 = vmul.f32 %v3716_v14, %v1237_v44  ;;  %2319 = vpow2.f32 %v1397_v60  ;;  %vm821_vm12 = vcmp.lt.f32.partialorder %v3999_v63, 0.0 }
 0x2bd   : > { %v1110_v31 = vadd.f32 1.4214138, %v1078_v30  ;;  %v1399_v52 = vmul.f32 1.442695, %v1336_v26  ;;  %v853_v30 = vsel %vm821_vm12, -1.0, %v3956_v28  ;;  %v759_v60 = vmul.f32 0.5, %v3704_v49 }
 0x2be   : > { %v1047_v15 = vadd.f32 -1.4531521, %v1015_v27  ;;  %v856_v37 = vsel %vm824_vm15, -1.0, %v3956_v28  ;;  %v758_v49 = vmul.f32 0.5, %v3680_v7  ;;  %v760_v59 = vmul.f32 0.5, %v3726_v23 }
 0x2bf   : > { %v1142_v43 = vmul.f32 %v2310_v58, %v1110_v31  ;;  %2321 = vpow2.f32 %v1399_v52 }
 0x2c0   : > { %v1079_v16 = vmul.f32 %v2312_v34, %v1047_v15  ;;  %v4000_v15 = vld [vmem:[#allocation16_spill] sm:$0xff] }
 0x2c1   : > { %v2314_v55 = vpop.eup %2313  ;;  %v1174_v18 = vadd.f32 -0.28449672, %v1142_v43  ;;  %v757_v43 = vmul.f32 0.5, %v4000_v15 }
 0x2c2   : > { %1761 = vmatmul.mubr.bf16.gmra.mrb[8].mxu1 %v1565_v17  ;;  %v1111_v54 = vadd.f32 1.4214138, %v1079_v16  ;;  %v1016_v47 = vmul.f32 1.0614054, %v2314_v55  ;;  %v2316_v32 = vpop.eup %2315 }
 0x2c3   : > { %1768 = vmatprep.mubr.bf16.mxu1 %v1568_v25  ;;  %v1206_v57 = vmul.f32 %v2310_v58, %v1174_v18  ;;  %v1429_v42 = vmul.f32 %v2316_v32, %v1269_v53 }
 0x2c4   : > { %v1143_v51 = vmul.f32 %v2312_v34, %v1111_v54  ;;  %v1048_v1 = vadd.f32 -1.4531521, %v1016_v47 }
 0x2c5   : > { %v1238_v0 = vadd.f32 0.2548296, %v1206_v57  ;;  %v1461_v14 = vsub.f32 1.0, %v1429_v42  ;;  %v2318_v29 = vpop.eup %2317 }
 0x2c6   : > { %v1175_v19 = vadd.f32 -0.28449672, %v1143_v51  ;;  %v1080_v2 = vmul.f32 %v2314_v55, %v1048_v1  ;;  %v2320_v21 = vpop.eup %2319 }
 0x2c7   : > { %v1270_v17 = vmul.f32 %v2310_v58, %v1238_v0  ;;  %v1493_v9 = vmul.f32 %v1461_v14, %v853_v30 }
 0x2c8   : > { %v1207_v40 = vmul.f32 %v2312_v34, %v1175_v19  ;;  %v1112_v5 = vadd.f32 1.4214138, %v1080_v2 }
 0x2c9   : > { %v1430_v22 = vmul.f32 %v2318_v29, %v1270_v17  ;;  %v1525_v39 = vadd.f32 1.0, %v1493_v9  ;;  %v2322_v44 = vpop.eup %2321 }
 0x2ca   : > { %1769 = vmatmul.mubr.bf16.gmra.mrb[12].mxu1 %v1567_v61  ;;  %v1239_v25 = vadd.f32 0.2548296, %v1207_v40  ;;  %v1144_v36 = vmul.f32 %v2314_v55, %v1112_v5 }
 0x2cb   : > { %1776 = vmatprep.mubr.bf16.mxu1 %v1570_v11  ;;  %v1462_v61 = vsub.f32 1.0, %v1430_v22  ;;  %v1557_v33 = vmul.f32 %v1525_v39, %v757_v43 }
 0x2cc   : > { %v1271_v6 = vmul.f32 %v2312_v34, %v1239_v25  ;;  %v1176_v46 = vadd.f32 -0.28449672, %v1144_v36  ;;  %v855_v34 = vsel %vm823_vm13, -1.0, %v3956_v28 }
 0x2cd   : > { %v1494_v16 = vmul.f32 %v1462_v61, %v854_v8 }
 0x2ce   : > { %v1431_v58 = vmul.f32 %v2320_v21, %v1271_v6  ;;  %v1208_v27 = vmul.f32 %v2314_v55, %v1176_v46 }
 0x2cf   : > { %v1526_v35 = vadd.f32 1.0, %v1494_v16 }
 0x2d0   : > { %v1463_v11 = vsub.f32 1.0, %v1431_v58  ;;  %v1240_v31 = vadd.f32 0.2548296, %v1208_v27 }
 0x2d1   : > { %v1558_v54 = vmul.f32 %v1526_v35, %v758_v49 }
 0x2d2   : > { %1777 = vmatmul.mubr.bf16.gmra.mrb[16].mxu1 %v1569_v10  ;;  %v1495_v13 = vmul.f32 %v1463_v11, %v855_v34  ;;  %v1272_v50 = vmul.f32 %v2314_v55, %v1240_v31 }
 0x2d3   : > { %1784 = vmatprep.mubr.bf16.mxu1 %v1572_v41 }
 0x2d4   : > { %v1527_v18 = vadd.f32 1.0, %v1495_v13  ;;  %v1432_v45 = vmul.f32 %v2322_v44, %v1272_v50 }
 0x2d6   : > { %v1559_v10 = vmul.f32 %v1527_v18, %v759_v60  ;;  %v1464_v26 = vsub.f32 1.0, %v1432_v45 }
 0x2d8   : > { %v1496_v41 = vmul.f32 %v1464_v26, %v856_v37  ;;  %v1575_v55 = vpack.c.bf16 %v1559_v10, %v1557_v33 }
 0x2da   : > { %1785 = vmatmul.mubr.bf16.gmra.mrb[20].mxu1 %v1571_v12  ;;  %v1528_v53 = vadd.f32 1.0, %v1496_v41 }
 0x2db   : > { %1792 = vmatprep.mubr.bf16.mxu1 %v1574_v20 }
 0x2dc   : > { %v1560_v47 = vmul.f32 %v1528_v53, %v760_v59 }
 0x2de   : > { %v1576_v28 = vpack.c.bf16 %v1560_v47, %v1558_v54 }
 0x2e2   : > { %1793 = vmatmul.mubr.bf16.gmra.mrb[24].mxu1 %v1573_v38 }
 0x2e3   : > { %1800 = vmatprep.mubr.bf16.mxu1 %v1576_v28 }
 0x2ea   : > { %1801 = vmatmul.mubr.bf16.gmra.mrb[28].mxu1 %v1575_v55 }
 0x385   : > { %v2000_v62 = vpop.f32.mrb[0].mxu1 }
 0x386   : > { %v2001_v7 = vpop.f32.mrb[1].mxu1 }
 0x387   : > { %v2002_v4 = vadd.f32 %v2001_v7, %v2000_v62  ;;  %v2003_v23 = vpop.f32.mrb[2].mxu1 }
 0x388   : > { %v2004_v56 = vpop.f32.mrb[3].mxu1 }
 0x389   : > { %v1747_v12 = vadd.f32 %v2002_v4, %v3826_v24  ;;  %v2005_v20 = vadd.f32 %v2004_v56, %v2003_v23 }
 0x38b   : > { %1809 = vst [vmem:[%s3831_s28] sm:$0xff] %v1747_v12  ;;  %v1750_v3 = vadd.f32 %v2005_v20, %v3826_v24 }
 0x38d   : > { %1810 = vst [vmem:[%s3831_s28 + $0x8] sm:$0xff] %v1750_v3  ;;  %v2006_v48 = vpop.f32.mrb[4].mxu1 }
 0x38e   : > { %v2007_v38 = vpop.f32.mrb[5].mxu1 }
 0x38f   : > { %v2008_v57 = vadd.f32 %v2007_v38, %v2006_v48  ;;  %v2009_v51 = vpop.f32.mrb[6].mxu1 }
 0x390   : > { %v2010_v1 = vpop.f32.mrb[7].mxu1 }
 0x391   : > { %v1755_v32 = vadd.f32 %v2008_v57, %v3826_v24  ;;  %v2011_v0 = vadd.f32 %v2010_v1, %v2009_v51 }
 0x393   : > { %1811 = vst [vmem:[%s3831_s28 + $0x10] sm:$0xff] %v1755_v32  ;;  %v1758_v52 = vadd.f32 %v2011_v0, %v3826_v24 }
 0x395   : > { %1812 = vst [vmem:[%s3831_s28 + $0x18] sm:$0xff] %v1758_v52  ;;  %v2012_v42 = vpop.f32.mrb[8].mxu1 }
 0x396   : > { %v2013_v19 = vpop.f32.mrb[9].mxu1 }
 0x397   : > { %v2014_v2 = vadd.f32 %v2013_v19, %v2012_v42  ;;  %v2015_v17 = vpop.f32.mrb[10].mxu1 }
 0x398   : > { %v2016_v40 = vpop.f32.mrb[11].mxu1 }
 0x399   : > { %v1763_v5 = vadd.f32 %v2014_v2, %v3826_v24  ;;  %v2017_v63 = vadd.f32 %v2016_v40, %v2015_v17 }
 0x39b   : > { %1813 = vst [vmem:[%s3831_s28 + $0x20] sm:$0xff] %v1763_v5  ;;  %v1766_v14 = vadd.f32 %v2017_v63, %v3826_v24 }
 0x39d   : > { %1814 = vst [vmem:[%s3831_s28 + $0x28] sm:$0xff] %v1766_v14  ;;  %v2018_v25 = vpop.f32.mrb[12].mxu1 }
 0x39e   : > { %v2019_v36 = vpop.f32.mrb[13].mxu1 }
 0x39f   : > { %v2020_v29 = vadd.f32 %v2019_v36, %v2018_v25  ;;  %v2021_v22 = vpop.f32.mrb[14].mxu1 }
 0x3a0   : > { %v2022_v6 = vpop.f32.mrb[15].mxu1 }
 0x3a1   : > { %v1771_v46 = vadd.f32 %v2020_v29, %v3826_v24  ;;  %v2023_v21 = vadd.f32 %v2022_v6, %v2021_v22 }
 0x3a3   : > { %1815 = vst [vmem:[%s3831_s28 + $0x30] sm:$0xff] %v1771_v46  ;;  %v1774_v30 = vadd.f32 %v2023_v21, %v3826_v24 }
 0x3a5   : > { %1816 = vst [vmem:[%s3831_s28 + $0x38] sm:$0xff] %v1774_v30  ;;  %v2024_v9 = vpop.f32.mrb[16].mxu1 }
 0x3a6   : > { %v2025_v58 = vpop.f32.mrb[17].mxu1 }
 0x3a7   : > { %v2026_v27 = vadd.f32 %v2025_v58, %v2024_v9  ;;  %v2027_v61 = vpop.f32.mrb[18].mxu1 }
 0x3a8   : > { %v2028_v11 = vpop.f32.mrb[19].mxu1 }
 0x3a9   : > { %v1779_v31 = vadd.f32 %v2026_v27, %v3826_v24  ;;  %v2029_v34 = vadd.f32 %v2028_v11, %v2027_v61 }
 0x3ab   : > { %1817 = vst [vmem:[%s3831_s28 + $0x40] sm:$0xff] %v1779_v31  ;;  %v1782_v39 = vadd.f32 %v2029_v34, %v3826_v24 }
 0x3ad   : > { %1818 = vst [vmem:[%s3831_s28 + $0x48] sm:$0xff] %v1782_v39  ;;  %v2030_v13 = vpop.f32.mrb[20].mxu1 }
 0x3ae   : > { %v2031_v50 = vpop.f32.mrb[21].mxu1 }
 0x3af   : > { %v2032_v44 = vadd.f32 %v2031_v50, %v2030_v13  ;;  %v2033_v15 = vpop.f32.mrb[22].mxu1 }
 0x3b0   : > { %v2034_v43 = vpop.f32.mrb[23].mxu1 }
 0x3b1   : > { %v1787_v8 = vadd.f32 %v2032_v44, %v3826_v24  ;;  %v2035_v60 = vadd.f32 %v2034_v43, %v2033_v15 }
 0x3b3   : > { %1819 = vst [vmem:[%s3831_s28 + $0x50] sm:$0xff] %v1787_v8  ;;  %v1790_v16 = vadd.f32 %v2035_v60, %v3826_v24 }
 0x3b5   : > { %1820 = vst [vmem:[%s3831_s28 + $0x58] sm:$0xff] %v1790_v16  ;;  %v2036_v18 = vpop.f32.mrb[24].mxu1 }
 0x3b6   : > { %v2037_v45 = vpop.f32.mrb[25].mxu1 }
 0x3b7   : > { %v2038_v33 = vadd.f32 %v2037_v45, %v2036_v18  ;;  %v2039_v10 = vpop.f32.mrb[26].mxu1 }
 0x3b8   : > { %v2040_v26 = vpop.f32.mrb[27].mxu1 }
 0x3b9   : > { %v1795_v37 = vadd.f32 %v2038_v33, %v3826_v24  ;;  %v2041_v35 = vadd.f32 %v2040_v26, %v2039_v10 }
 0x3bb   : > { %1821 = vst [vmem:[%s3831_s28 + $0x60] sm:$0xff] %v1795_v37  ;;  %v1798_v41 = vadd.f32 %v2041_v35, %v3826_v24 }
 0x3bd   : > { %1822 = vst [vmem:[%s3831_s28 + $0x68] sm:$0xff] %v1798_v41  ;;  %v2042_v55 = vpop.f32.mrb[28].mxu1 }
 0x3be   : > { %v2043_v49 = vpop.f32.mrb[29].mxu1 }
 0x3bf   : > { %v2044_v59 = vadd.f32 %v2043_v49, %v2042_v55  ;;  %v2045_v53 = vpop.f32.mrb[30].mxu1 }
 0x3c0   : > { %v2046_v54 = vpop.f32.mrb[31].mxu1 }
 0x3c1   : > { %v1803_v47 = vadd.f32 %v2044_v59, %v3826_v24  ;;  %v2047_v28 = vadd.f32 %v2046_v54, %v2045_v53 }
 0x3c3   : > { %1823 = vst [vmem:[%s3831_s28 + $0x70] sm:$0xff] %v1803_v47  ;;  %v1806_v62 = vadd.f32 %v2047_v28, %v3826_v24 }
 0x3c5   : > { %1824 = vst [vmem:[%s3831_s28 + $0x78] sm:$0xff] %v1806_v62 }
 0x3c6   : > { %2422 = shalt.err (!%p2419_p1)
}
 0x3c7   : > { %s2423_s14 = scalar_lea.hbm %s3866_s12, 2048  ;;  %s2427_s15 = scalar_lea.hbm %s3920_s5, 4096 }
 0x3c8   : > { %p2424_p13 = scmp.ne.s32.totalorder %s3866_s12, %s2423_s14  ;;  %p2428_p4 = scmp.lt.u32.totalorder %s3866_s12, %s3920_s5 }
 0x3c9   : > { %p2429_p7 = scmp.lt.u32.totalorder %s2427_s15, %s2423_s14  ;;  %p2431_p11 = scmp.lt.u32.totalorder %s2423_s14, %s3866_s12 }
 0x3ca   : > { %p2425_p6 = pnand %p2424_p13, %p4001_p0 }
 0x3cb   : > { %p2430_p8 = por %p2429_p7, %p2428_p4 }
 0x3cc   : > { %p2426_p10 = pneg %p2425_p6 }
 0x3cd   : > { %p2432_p2 = por %p2431_p11, %p2430_p8 }
 0x3cf   : > { %p2433_p3 = pnand %p2432_p2, %p2426_p10 }
 0x3d1   : > { %2436 = shalt.err (!%p2433_p3)
}
 0x3d2   : > { %s2491_s13 = smov 128   ;;  %s2492_s11 = smov 8  }
 0x3d3   : > { %2058 = dma.vmem_to_hbm [thread:$0]  (%p4001_p0), %s3868_s17, 2048, %s3866_s12, %s1826_s22, %s2491_s13, %s2491_s13, %s2492_s11  }
 0x3d4 PF: > { %s1854_s29 = sand.u32 1, %s2467_s18   ;;  %p4002_p5 = scmp.ne.s32.totalorder %s3938_s25, 0 }
 0x3d5   : > { %p4003_p9 = scmp.ge.s32.totalorder %s2479_s21, 2  ;;  %s1855_s30 = scalar_lea.sflag [#allocation4], %s1854_s29 }
 0x3d7   : > { %p2072_p12 = pnand %p4003_p9, %p4002_p5 }
 0x3d9   : > { %2462 = dma.done.wait (!%p2072_p12), %s1855_s30, 2048  }
 0x3da   : > { %2464 = vsyncadd (!%p2072_p12), %s1855_s30, 4294965248  ;;  %p19_p1 = scmp.ge.s32.totalorder %s2636_s23, 4   ;;  %s4004_s18 = smov %s2471_s19 }
 0x3db   : > { %s4005_s19 = smov %s2475_s20  ;;  %s4006_s20 = smov %s2645_s7 }
 0x3dc   : > { %s4007_s21 = smov %s2636_s23  ;;  %21 = sbr.rel (!%p19_p1) target bundleno = 6 (0x6), region = 93 }
 0x3e3   :  { %1860 = vsyncpa [#allocation3], 1 }
 0x3e4   :  { %1862 = vsyncpa [#allocation3 + $0x1], 1 }
 0x3e5   :  { %1863 = vsyncpa [#allocation6], 1 }
 0x3e6   :  { %1864 = vsyncpa [#allocation4], 1 }
 0x3e7   :  { %1866 = vsyncpa [#allocation4 + $0x1], 1 }

</bundles_post_ra>
